<compile_context>
chip_gen: v6e
topology: v6e:2x2x1
jax: 0.10.0
libtpu: 0.0.40
codegen_flags: <defaults>
</compile_context>

<pallas_src>
import math

import jax
import jax.numpy as jnp
from jax.experimental import pallas as pl
from jax.experimental.pallas import tpu as pltpu

_LANES = 128
_SUBLANES = 8
_VMEM_BLOCK_BUDGET = 12 * 1024 * 1024   # bytes of pipelined blocks we aim for
_VMEM_LIMIT = 32 * 1024 * 1024          # scoped-VMEM limit handed to Mosaic
_MAX_UNROLLED_MODALITIES = 8


def _fusion_kernel(x_ref, w_ref, o_ref):
    # x_ref: (M, tbr, 128)  modality-major, lane-dense (batch*class) tile
    # w_ref: (M, tbr, 128)  per-lane weight pattern, VMEM resident (constant index)
    # o_ref: (tbr, 128)     lane-dense output tile
    num_modalities = x_ref.shape[0]
    acc = x_ref[0].astype(jnp.float32) * w_ref[0]
    for m in range(1, num_modalities):          # tiny static unroll (guarded)
        acc = acc + x_ref[m].astype(jnp.float32) * w_ref[m]
    o_ref[...] = acc.astype(o_ref.dtype)


def _round_up(a, b):
    return -(-a // b) * b


def _choose_row_tile(num_rows, num_classes, num_modalities, x_bytes, o_bytes):
    """Row tile for the (tbr, 128) blocks.

    Constraints: multiple of 8 sublanes and of the weight-pattern phase
    (so C | tbr*128 and every block sees the same lane pattern); as large as
    the VMEM budget allows; rebalanced so the last block carries little pad.
    """
    phase = num_classes // math.gcd(num_classes, _LANES)
    step = _SUBLANES * phase // math.gcd(_SUBLANES, phase)
    # Double-buffered x, (conservatively double-buffered) weights, double out.
    per_row = _LANES * (2 * num_modalities * x_bytes
                        + 2 * num_modalities * 4
                        + 2 * o_bytes)
    tbr = max(step, (_VMEM_BLOCK_BUDGET // per_row) // step * step)
    num_tiles = -(-num_rows // tbr)
    tbr = _round_up(-(-num_rows // num_tiles), step)
    return tbr


@jax.jit
def _forward_tuple(x, weights):
    """x: [B, C, M], weights: [C, M] -> tuple of C arrays, each [B, 1]."""
    B, C, M = x.shape

    if M > _MAX_UNROLLED_MODALITIES:
        # TODO(synk): for large num_modalities put M on a reduction grid axis
        # instead of the in-kernel unroll; plain XLA fallback meanwhile.
        out = jnp.einsum("bcm,cm->bc", x, weights.astype(x.dtype))
        return tuple(out[:, j:j + 1] for j in range(C))

    flat = B * C
    rows_needed = -(-flat // _LANES)
    tbr = _choose_row_tile(rows_needed, C, M,
                           x.dtype.itemsize, x.dtype.itemsize)
    flat_pad = _round_up(flat, tbr * _LANES)
    rows = flat_pad // _LANES
    grid = (rows // tbr,)

    # Single relayout pass [B, C, M] -> modality-major [M, B*C] (fused with
    # the zero-pad under this jit), then a free fold to [M, rows, 128].
    xt = jnp.transpose(x, (2, 0, 1)).reshape(M, flat)
    if flat_pad != flat:
        xt = jnp.pad(xt, ((0, 0), (0, flat_pad - flat)))
    xt = xt.reshape(M, rows, _LANES)

    # Per-lane weight pattern: wtile[m, r, l] == W[(r*128 + l) % C, m].
    # Correct for every block because tbr*128 is a multiple of C.
    reps = (tbr * _LANES) // C
    wtile = jnp.tile(weights.astype(jnp.float32).T[:, None, :], (1, reps, 1))
    wtile = wtile.reshape(M, tbr, _LANES)

    out = pl.pallas_call(
        _fusion_kernel,
        out_shape=jax.ShapeDtypeStruct((rows, _LANES), x.dtype),
        grid=grid,
        in_specs=[
            pl.BlockSpec((M, tbr, _LANES), lambda i: (0, i, 0)),   # x tiles
            pl.BlockSpec((M, tbr, _LANES), lambda i: (0, 0, 0)),   # weights (resident)
        ],
        out_specs=pl.BlockSpec((tbr, _LANES), lambda i: (i, 0)),
        compiler_params=pltpu.CompilerParams(
            dimension_semantics=("parallel",),
            vmem_limit_bytes=_VMEM_LIMIT,
        ),
    )(xt, wtile)                                           # [rows, 128]

    out = out.reshape(flat_pad)[:flat].reshape(B, C)
    # Match PyTorch: one [batch, 1] tensor per class, split inside the jit so
    # the whole forward is a single dispatch.
    return tuple(out[:, j:j + 1] for j in range(C))


def fusion_class_layer_forward(x, weights):
    """x: [B, C, M], weights: [C, M] -> list of C arrays, each [B, 1]."""
    B, C, M = x.shape
    assert weights.shape == (C, M)
    return list(_forward_tuple(x, weights))


def init_weights(key, num_classes, num_modalities, dtype=jnp.float32):
    # Mimics nn.Linear default init: U(-1/sqrt(in), 1/sqrt(in))
    bound = 1.0 / jnp.sqrt(jnp.asarray(num_modalities, dtype))
    return jax.random.uniform(
        key, (num_classes, num_modalities), dtype=dtype, minval=-bound, maxval=bound
    )


if __name__ == "__main__":
    num_classes = 4
    num_modalities = 3

    key = jax.random.PRNGKey(0)
    kx, kw, kx2 = jax.random.split(key, 3)
    W = init_weights(kw, num_classes, num_modalities)

    # Small shape consistent with the module.
    batch = 2
    x = jax.random.normal(kx, (batch, num_classes, num_modalities), dtype=jnp.float32)
    outs = [jax.block_until_ready(o) for o in fusion_class_layer_forward(x, W)]
    ref = jnp.einsum("bjm,jm->bj", x, W)
    stacked = jnp.concatenate(outs, axis=1)                # [B, C]
    assert stacked.shape == (batch, num_classes)
    assert all(o.shape == (batch, 1) for o in outs)
    assert jnp.allclose(stacked, ref, atol=1e-5, rtol=1e-5)

    # Larger ragged batch: exercises lane padding, the resident weight block,
    # a multi-step grid and the rebalanced tile size.
    batch2 = 70001
    x2 = jax.random.normal(kx2, (batch2, num_classes, num_modalities), dtype=jnp.float32)
    outs2 = [jax.block_until_ready(o) for o in fusion_class_layer_forward(x2, W)]
    ref2 = jnp.einsum("bjm,jm->bj", x2, W)
    stacked2 = jnp.concatenate(outs2, axis=1)
    assert stacked2.shape == (batch2, num_classes)
    assert all(o.shape == (batch2, 1) for o in outs2)
    assert jnp.allclose(stacked2, ref2, atol=1e-5, rtol=1e-5)

    print("KERNEL_OK")
</pallas_src>

<mosaic_0001>
module attributes {stable_mosaic.version = 11 : i64} {
  func.func @_fusion_kernel(%arg0: i32, %arg1: memref<3x8x128xf32, #tpu.memory_space<vmem>>, %arg2: memref<3x8x128xf32, #tpu.memory_space<vmem>>, %arg3: memref<8x128xf32, #tpu.memory_space<vmem>>) attributes {dimension_semantics = [#tpu.dimension_semantics<parallel>], iteration_bounds = array<i64: 1>, scalar_prefetch = 0 : i64, scratch_operands = 0 : i64, tpu.core_type = #tpu.core_type<tc>, window_params = [{transform_indices = @transform_0, window_bounds = array<i64: 3, 8, 128>}, {pipeline_mode = #tpu.pipeline_mode<synchronous>, transform_indices = @transform_1, window_bounds = array<i64: 3, 8, 128>}, {transform_indices = @transform_2, window_bounds = array<i64: 8, 128>}]} {
    %c0 = arith.constant 0 : index
    %c0_0 = arith.constant 0 : index
    %c0_1 = arith.constant 0 : index
    %0 = vector.load %arg1[%c0, %c0_0, %c0_1] : memref<3x8x128xf32, #tpu.memory_space<vmem>>, vector<1x8x128xf32>
    %1 = vector.shape_cast %0 : vector<1x8x128xf32> to vector<8x128xf32>
    %c0_2 = arith.constant 0 : index
    %c0_3 = arith.constant 0 : index
    %c0_4 = arith.constant 0 : index
    %2 = vector.load %arg2[%c0_2, %c0_3, %c0_4] : memref<3x8x128xf32, #tpu.memory_space<vmem>>, vector<1x8x128xf32>
    %3 = vector.shape_cast %2 : vector<1x8x128xf32> to vector<8x128xf32>
    %4 = arith.mulf %1, %3 : vector<8x128xf32>
    %c1 = arith.constant 1 : index
    %c0_5 = arith.constant 0 : index
    %c0_6 = arith.constant 0 : index
    %5 = vector.load %arg1[%c1, %c0_5, %c0_6] : memref<3x8x128xf32, #tpu.memory_space<vmem>>, vector<1x8x128xf32>
    %6 = vector.shape_cast %5 : vector<1x8x128xf32> to vector<8x128xf32>
    %c1_7 = arith.constant 1 : index
    %c0_8 = arith.constant 0 : index
    %c0_9 = arith.constant 0 : index
    %7 = vector.load %arg2[%c1_7, %c0_8, %c0_9] : memref<3x8x128xf32, #tpu.memory_space<vmem>>, vector<1x8x128xf32>
    %8 = vector.shape_cast %7 : vector<1x8x128xf32> to vector<8x128xf32>
    %9 = arith.mulf %6, %8 : vector<8x128xf32>
    %10 = arith.addf %4, %9 : vector<8x128xf32>
    %c2 = arith.constant 2 : index
    %c0_10 = arith.constant 0 : index
    %c0_11 = arith.constant 0 : index
    %11 = vector.load %arg1[%c2, %c0_10, %c0_11] : memref<3x8x128xf32, #tpu.memory_space<vmem>>, vector<1x8x128xf32>
    %12 = vector.shape_cast %11 : vector<1x8x128xf32> to vector<8x128xf32>
    %c2_12 = arith.constant 2 : index
    %c0_13 = arith.constant 0 : index
    %c0_14 = arith.constant 0 : index
    %13 = vector.load %arg2[%c2_12, %c0_13, %c0_14] : memref<3x8x128xf32, #tpu.memory_space<vmem>>, vector<1x8x128xf32>
    %14 = vector.shape_cast %13 : vector<1x8x128xf32> to vector<8x128xf32>
    %15 = arith.mulf %12, %14 : vector<8x128xf32>
    %16 = arith.addf %10, %15 : vector<8x128xf32>
    %c0_15 = arith.constant 0 : index
    %c0_16 = arith.constant 0 : index
    %17 = vector.load %arg3[%c0_15, %c0_16] : memref<8x128xf32, #tpu.memory_space<vmem>>, vector<8x128xf32>
    tpu.vector_store %arg3[%c0_15, %c0_16], %16 {strides = array<i32>} : memref<8x128xf32, #tpu.memory_space<vmem>>, vector<8x128xf32>,
    return
  }
  func.func @transform_0(%arg0: i32) -> (i32, i32, i32) {
    %c0_i32 = arith.constant 0 : i32
    %c0_i32_0 = arith.constant 0 : i32
    %c0_i32_1 = arith.constant 0 : i32
    return %c0_i32, %arg0, %c0_i32_0 : i32, i32, i32
  }
  func.func @transform_1(%arg0: i32) -> (i32, i32, i32) {
    %c0_i32 = arith.constant 0 : i32
    %c0_i32_0 = arith.constant 0 : i32
    %c0_i32_1 = arith.constant 0 : i32
    %c0_i32_2 = arith.constant 0 : i32
    return %c0_i32, %c0_i32_0, %c0_i32_1 : i32, i32, i32
  }
  func.func @transform_2(%arg0: i32) -> (i32, i32) {
    %c0_i32 = arith.constant 0 : i32
    %c0_i32_0 = arith.constant 0 : i32
    return %arg0, %c0_i32 : i32, i32
  }
}

</mosaic_0001>

<bundles_post_ra>
// kernel: tile.7
= control target key start
LH: loop header
LB: loop body
LE: loop exit
PB: predicated region body
PF: predicated region fallthrough
CT: control target
= control target key end

     0   :  { %vm5_vm0 = vcmask 1041409   ;;  %vm9_vm1 = vcmask 1042434   ;;  %vm13_vm2 = vcmask 1043459   ;;  %vm17_vm3 = vcmask 1044484   ;;  %s4185_s27 = smov 124   ;;  %s4186_s18 = smov 120   ;;  %s7751_s0 = inlined_call_operand.vmem [shape: f32[3,256,1,1,4], index: 0, kind: input, shape index: {}]   ;;  %s7752_s1 = inlined_call_operand.vmem [shape: f32[3,8,128], index: 1, kind: output, shape index: {}]  }
   0x1   :  { %vm21_vm4 = vcmask 1045509   ;;  %vm25_vm5 = vcmask 1046534   ;;  %vm29_vm6 = vcmask 1047559   ;;  %v3348_v0 = vld [vmem:[%s7751_s0 + $0x1f] sm:$0x1]   ;;  %s4187_s9 = smov 116  }
   0x2   :  { %v3349_v1 = vld [vmem:[%s7751_s0 + $0x3e] sm:$0x2]   ;;  %v3374_v38 = vld [vmem:[%s7751_s0 + $0x1e] sm:$0x1]   ;;  %s4188_s28 = smov 112   ;;  %s4189_s19 = smov 108  }
   0x3   :  { %v3350_v2 = vld [vmem:[%s7751_s0 + $0x5d] sm:$0x4]   ;;  %v104_v4 = vsel %vm5_vm0, %v3349_v1, %v3348_v0  ;;  %v3375_v41 = vld [vmem:[%s7751_s0 + $0x3d] sm:$0x2]   ;;  %s4190_s7 = smov 104   ;;  %s4191_s29 = smov 100  }
   0x4   :  { %v3351_v3 = vld [vmem:[%s7751_s0 + $0x7c] sm:$0x8]   ;;  %v108_v8 = vsel %vm9_vm1, %v3350_v2, %v104_v4  ;;  %v3376_v42 = vld [vmem:[%s7751_s0 + $0x5c] sm:$0x4]   ;;  %v208_v46 = vsel %vm5_vm0, %v3375_v41, %v3374_v38  ;;  %v3412_v41 = vld [vmem:[%s7751_s0 + $0x199] sm:$0x10]  }
   0x5   :  { %v3352_v5 = vld [vmem:[%s7751_s0 + $0x9b] sm:$0x10]   ;;  %v112_v12 = vsel %vm13_vm2, %v3351_v3, %v108_v8  ;;  %v3377_v43 = vld [vmem:[%s7751_s0 + $0x7b] sm:$0x8]   ;;  %v212_v51 = vsel %vm9_vm1, %v3376_v42, %v208_v46  ;;  %v3414_v46 = vld [vmem:[%s7751_s0 + $0x1d7] sm:$0x40]  }
   0x6   :  { %v3353_v6 = vld [vmem:[%s7751_s0 + $0xba] sm:$0x20]   ;;  %v116_v17 = vsel %vm17_vm3, %v3352_v5, %v112_v12  ;;  %v3378_v47 = vld [vmem:[%s7751_s0 + $0x9a] sm:$0x10]   ;;  %v216_v56 = vsel %vm13_vm2, %v3377_v43, %v212_v51  ;;  %v3418_v51 = vld [vmem:[%s7751_s0 + $0x23c] sm:$0x2]  }
   0x7   :  { %v3354_v7 = vld [vmem:[%s7751_s0 + $0xd9] sm:$0x40]   ;;  %v120_v22 = vsel %vm21_vm4, %v3353_v6, %v116_v17  ;;  %v3379_v48 = vld [vmem:[%s7751_s0 + $0xb9] sm:$0x20]   ;;  %v220_v62 = vsel %vm17_vm3, %v3378_v47, %v216_v56  ;;  %v3415_v47 = vld [vmem:[%s7751_s0 + $0x1f6] sm:$0x80]  }
   0x8   :  { %v3355_v9 = vld [vmem:[%s7751_s0 + $0xf8] sm:$0x80]   ;;  %v124_v27 = vsel %vm25_vm5, %v3354_v7, %v120_v22  ;;  %v3380_v49 = vld [vmem:[%s7751_s0 + $0xd8] sm:$0x40]   ;;  %v224_v3 = vsel %vm21_vm4, %v3379_v48, %v220_v62  ;;  %v3401_v22 = vld [vmem:[%s7751_s0 + $0x3c] sm:$0x2]  }
   0x9   :  { %v3365_v10 = vld [vmem:[%s7751_s0 + $0x21f] sm:$0x1]   ;;  %v128_v33 = vsel %vm29_vm6, %v3355_v9, %v124_v27  ;;  %v3381_v52 = vld [vmem:[%s7751_s0 + $0xf7] sm:$0x80]   ;;  %v228_v8 = vsel %vm25_vm5, %v3380_v49, %v224_v3  ;;  %v3420_v56 = vld [vmem:[%s7751_s0 + $0x27a] sm:$0x8]  }
   0xa   :  { %v3366_v11 = vld [vmem:[%s7751_s0 + $0x23e] sm:$0x2]   ;;  %129 = vrot.lane.b32.xlu0 %v128_v33, %s4185_s27  ;;  %v3382_v53 = vld [vmem:[%s7751_s0 + $0x11e] sm:$0x1]   ;;  %v3407_v33 = vld [vmem:[%s7751_s0 + $0xf6] sm:$0x80]  }
   0xb   :  { %v173_v13 = vsel %vm5_vm0, %v3366_v11, %v3365_v10  ;;  %v3367_v14 = vld [vmem:[%s7751_s0 + $0x25d] sm:$0x4]   ;;  %v3383_v54 = vld [vmem:[%s7751_s0 + $0x13d] sm:$0x2]   ;;  %v3423_v62 = vld [vmem:[%s7751_s0 + $0x2d7] sm:$0x40]  }
   0xc   :  { %v3368_v15 = vld [vmem:[%s7751_s0 + $0x27c] sm:$0x8]   ;;  %v177_v18 = vsel %vm9_vm1, %v3367_v14, %v173_v13  ;;  %v242_v57 = vsel %vm5_vm0, %v3383_v54, %v3382_v53  ;;  %v3384_v58 = vld [vmem:[%s7751_s0 + $0x15c] sm:$0x4]   ;;  %v232_v14 = vsel %vm29_vm6, %v3381_v52, %v228_v8  ;;  %v3419_v52 = vld [vmem:[%s7751_s0 + $0x25b] sm:$0x4]  }
   0xd   :  { %v3369_v16 = vld [vmem:[%s7751_s0 + $0x29b] sm:$0x10]   ;;  %v181_v23 = vsel %vm13_vm2, %v3368_v15, %v177_v18  ;;  %v3385_v59 = vld [vmem:[%s7751_s0 + $0x17b] sm:$0x8]   ;;  %v246_v63 = vsel %vm9_vm1, %v3384_v58, %v242_v57  ;;  %v3421_v57 = vld [vmem:[%s7751_s0 + $0x299] sm:$0x10]  }
   0xe   :  { %v3370_v19 = vld [vmem:[%s7751_s0 + $0x2ba] sm:$0x20]   ;;  %v185_v28 = vsel %vm17_vm3, %v3369_v16, %v181_v23  ;;  %v3386_v60 = vld [vmem:[%s7751_s0 + $0x19a] sm:$0x10]   ;;  %v250_v4 = vsel %vm13_vm2, %v3385_v59, %v246_v63  ;;  %v3402_v23 = vld [vmem:[%s7751_s0 + $0x5b] sm:$0x4]  }
   0xf   :  { %v3371_v20 = vld [vmem:[%s7751_s0 + $0x2d9] sm:$0x40]   ;;  %v189_v34 = vsel %vm21_vm4, %v3370_v19, %v185_v28  ;;  %v3387_v0 = vld [vmem:[%s7751_s0 + $0x1b9] sm:$0x20]   ;;  %v254_v9 = vsel %vm17_vm3, %v3386_v60, %v250_v4  ;;  %v3400_v19 = vld [vmem:[%s7751_s0 + $0x1d] sm:$0x1]  }
  0x10   :  { %v3372_v21 = vld [vmem:[%s7751_s0 + $0x2f8] sm:$0x80]   ;;  %v193_v39 = vsel %vm25_vm5, %v3371_v20, %v189_v34  ;;  %v3388_v1 = vld [vmem:[%s7751_s0 + $0x1d8] sm:$0x40]   ;;  %v258_v15 = vsel %vm21_vm4, %v3387_v0, %v254_v9  ;;  %v312_v27 = vsel %vm5_vm0, %v3401_v22, %v3400_v19  ;;  %v3404_v28 = vld [vmem:[%s7751_s0 + $0x99] sm:$0x10]  }
  0x11   :  { %v3356_v24 = vld [vmem:[%s7751_s0 + $0x11f] sm:$0x1]   ;;  %v197_v44 = vsel %vm29_vm6, %v3372_v21, %v193_v39  ;;  %v3389_v2 = vld [vmem:[%s7751_s0 + $0x1f7] sm:$0x80]   ;;  %v262_v20 = vsel %vm25_vm5, %v3388_v1, %v258_v15  ;;  %v3408_v34 = vld [vmem:[%s7751_s0 + $0x11d] sm:$0x1]  }
  0x12   :  { %v3357_v25 = vld [vmem:[%s7751_s0 + $0x13e] sm:$0x2]   ;;  %198 = vrot.lane.b32.xlu1 %v197_v44, %s4185_s27  ;;  %v3391_v5 = vld [vmem:[%s7751_s0 + $0x21e] sm:$0x1]   ;;  %v3410_v39 = vld [vmem:[%s7751_s0 + $0x15b] sm:$0x4]  }
  0x13   :  { %v3358_v26 = vld [vmem:[%s7751_s0 + $0x15d] sm:$0x4]   ;;  %v138_v29 = vsel %vm5_vm0, %v3357_v25, %v3356_v24  ;;  %v3392_v6 = vld [vmem:[%s7751_s0 + $0x23d] sm:$0x2]   ;;  %v3403_v24 = vld [vmem:[%s7751_s0 + $0x7a] sm:$0x8]   ;;  %v266_v25 = vsel %vm29_vm6, %v3389_v2, %v262_v20 }
  0x14   :  { %v3359_v30 = vld [vmem:[%s7751_s0 + $0x17c] sm:$0x8]   ;;  %v142_v35 = vsel %vm9_vm1, %v3358_v26, %v138_v29  ;;  %v3393_v7 = vld [vmem:[%s7751_s0 + $0x25c] sm:$0x4]   ;;  %v277_v10 = vsel %vm5_vm0, %v3392_v6, %v3391_v5  ;;  %v3405_v29 = vld [vmem:[%s7751_s0 + $0xb8] sm:$0x20]  }
  0x15   :  { %v3360_v31 = vld [vmem:[%s7751_s0 + $0x19b] sm:$0x10]   ;;  %v146_v40 = vsel %vm13_vm2, %v3359_v30, %v142_v35  ;;  %v3394_v11 = vld [vmem:[%s7751_s0 + $0x27b] sm:$0x8]   ;;  %v281_v16 = vsel %vm9_vm1, %v3393_v7, %v277_v10  ;;  %v3406_v30 = vld [vmem:[%s7751_s0 + $0xd7] sm:$0x40]  }
  0x16   :  { %v3361_v32 = vld [vmem:[%s7751_s0 + $0x1ba] sm:$0x20]   ;;  %v150_v45 = vsel %vm17_vm3, %v3360_v31, %v146_v40  ;;  %v3395_v12 = vld [vmem:[%s7751_s0 + $0x29a] sm:$0x10]   ;;  %233 = vrot.lane.b32.xlu1 %v232_v14, %s4186_s18  ;;  %v285_v21 = vsel %vm13_vm2, %v3394_v11, %v281_v16  ;;  %v3409_v35 = vld [vmem:[%s7751_s0 + $0x13c] sm:$0x2]  }
  0x17   :  { %v3362_v36 = vld [vmem:[%s7751_s0 + $0x1d9] sm:$0x40]   ;;  %v154_v50 = vsel %vm21_vm4, %v3361_v32, %v150_v45  ;;  %v3396_v13 = vld [vmem:[%s7751_s0 + $0x2b9] sm:$0x20]   ;;  %v289_v26 = vsel %vm17_vm3, %v3395_v12, %v285_v21  ;;  %v316_v32 = vsel %vm9_vm1, %v3402_v23, %v312_v27  ;;  %v346_v38 = vsel %vm5_vm0, %v3409_v35, %v3408_v34  ;;  %v3411_v40 = vld [vmem:[%s7751_s0 + $0x17a] sm:$0x8]  }
  0x18   :  { %v3363_v37 = vld [vmem:[%s7751_s0 + $0x1f8] sm:$0x80]   ;;  %v158_v55 = vsel %vm25_vm5, %v3362_v36, %v154_v50  ;;  %v3397_v17 = vld [vmem:[%s7751_s0 + $0x2d8] sm:$0x40]   ;;  %v293_v31 = vsel %vm21_vm4, %v3396_v13, %v289_v26  ;;  %v350_v44 = vsel %vm9_vm1, %v3410_v39, %v346_v38  ;;  %v3413_v45 = vld [vmem:[%s7751_s0 + $0x1b8] sm:$0x20]  }
  0x19   :  { %v162_v61 = vsel %vm29_vm6, %v3363_v37, %v158_v55  ;;  %v3398_v18 = vld [vmem:[%s7751_s0 + $0x2f7] sm:$0x80]   ;;  %v297_v36 = vsel %vm25_vm5, %v3397_v17, %v293_v31  ;;  %v320_v37 = vsel %vm13_vm2, %v3403_v24, %v316_v32  ;;  %v354_v49 = vsel %vm13_vm2, %v3411_v40, %v350_v44  ;;  %v3417_v50 = vld [vmem:[%s7751_s0 + $0x21d] sm:$0x1]   ;;  %v3426_v0 = vld [vmem:[%s7751_s0 + $0x1c] sm:$0x1]  }
  0x1a   :  { %163 = vrot.lane.b32.xlu0 %v162_v61, %s4185_s27  ;;  %v301_v42 = vsel %vm29_vm6, %v3398_v18, %v297_v36  ;;  %v324_v43 = vsel %vm17_vm3, %v3404_v28, %v320_v37  ;;  %v358_v54 = vsel %vm17_vm3, %v3412_v41, %v354_v49  ;;  %v381_v55 = vsel %vm5_vm0, %v3418_v51, %v3417_v50  ;;  %v3422_v58 = vld [vmem:[%s7751_s0 + $0x2b8] sm:$0x20]   ;;  %v3427_v3 = vld [vmem:[%s7751_s0 + $0x3b] sm:$0x2]   ;;  %s4192_s16 = smov 96   ;;  %s4193_s14 = smov 92  }
  0x1b   :  { %302 = vrot.lane.b32.xlu1 %v301_v42, %s4186_s18  ;;  %v328_v48 = vsel %vm21_vm4, %v3405_v29, %v324_v43  ;;  %v362_v60 = vsel %vm21_vm4, %v3413_v45, %v358_v54  ;;  %v385_v61 = vsel %vm9_vm1, %v3419_v52, %v381_v55  ;;  %v3424_v63 = vld [vmem:[%s7751_s0 + $0x2f6] sm:$0x80]   ;;  %v3428_v4 = vld [vmem:[%s7751_s0 + $0x5a] sm:$0x4]   ;;  %v416_v8 = vsel %vm5_vm0, %v3427_v3, %v3426_v0  ;;  %v3455_v52 = vld [vmem:[%s7751_s0 + $0x78] sm:$0x8]  }
  0x1c   :  { %v332_v53 = vsel %vm25_vm5, %v3406_v30, %v328_v48  ;;  %v366_v1 = vsel %vm25_vm5, %v3414_v46, %v362_v60  ;;  %v389_v2 = vsel %vm13_vm2, %v3420_v56, %v385_v61  ;;  %v3429_v5 = vld [vmem:[%s7751_s0 + $0x79] sm:$0x8]   ;;  %v420_v13 = vsel %vm9_vm1, %v3428_v4, %v416_v8  ;;  %v3452_v46 = vld [vmem:[%s7751_s0 + $0x1b] sm:$0x1]   ;;  %s4194_s3 = smov 88   ;;  %s4195_s23 = smov 84  }
  0x1d   :  { %v336_v59 = vsel %vm29_vm6, %v3407_v33, %v332_v53  ;;  %v370_v6 = vsel %vm29_vm6, %v3415_v47, %v366_v1  ;;  %v393_v7 = vsel %vm17_vm3, %v3421_v57, %v389_v2  ;;  %v3430_v9 = vld [vmem:[%s7751_s0 + $0x98] sm:$0x10]   ;;  %v424_v17 = vsel %vm13_vm2, %v3429_v5, %v420_v13  ;;  %v3453_v47 = vld [vmem:[%s7751_s0 + $0x3a] sm:$0x2]   ;;  %s4196_s12 = smov 80   ;;  %s4197_s4 = smov 76  }
  0x1e   :  { %267 = vrot.lane.b32.xlu0 %v266_v25, %s4186_s18  ;;  %v3431_v10 = vld [vmem:[%s7751_s0 + $0xb7] sm:$0x20]   ;;  %v397_v12 = vsel %vm21_vm4, %v3422_v58, %v393_v7  ;;  %v428_v22 = vsel %vm17_vm3, %v3430_v9, %v424_v17  ;;  %v3454_v48 = vld [vmem:[%s7751_s0 + $0x59] sm:$0x4]   ;;  %v520_v51 = vsel %vm5_vm0, %v3453_v47, %v3452_v46  ;;  %s4198_s21 = smov 72   ;;  %s4199_s20 = smov 68  }
  0x1f   :  { %v3432_v11 = vld [vmem:[%s7751_s0 + $0xd6] sm:$0x40]   ;;  %371 = vrot.lane.b32.xlu1 %v370_v6, %s4187_s9  ;;  %v401_v16 = vsel %vm25_vm5, %v3423_v62, %v397_v12  ;;  %v432_v27 = vsel %vm21_vm4, %v3431_v10, %v428_v22  ;;  %v3456_v53 = vld [vmem:[%s7751_s0 + $0x97] sm:$0x10]   ;;  %v524_v57 = vsel %vm9_vm1, %v3454_v48, %v520_v51  ;;  %v3491_v51 = vld [vmem:[%s7751_s0 + $0x1b5] sm:$0x20]  }
  0x20   :  { %v3433_v14 = vld [vmem:[%s7751_s0 + $0xf5] sm:$0x80]   ;;  %v405_v21 = vsel %vm29_vm6, %v3424_v63, %v401_v16  ;;  %v436_v32 = vsel %vm25_vm5, %v3432_v11, %v432_v27  ;;  %v3457_v54 = vld [vmem:[%s7751_s0 + $0xb6] sm:$0x20]   ;;  %v528_v62 = vsel %vm13_vm2, %v3455_v52, %v524_v57  ;;  %v3478_v27 = vld [vmem:[%s7751_s0 + $0x1a] sm:$0x1]  }
  0x21   :  { %v3434_v15 = vld [vmem:[%s7751_s0 + $0x11c] sm:$0x1]   ;;  %v440_v38 = vsel %vm29_vm6, %v3433_v14, %v436_v32  ;;  %v3458_v58 = vld [vmem:[%s7751_s0 + $0xd5] sm:$0x40]   ;;  %v532_v3 = vsel %vm17_vm3, %v3456_v53, %v528_v62  ;;  %s4200_s8 = smov 64   ;;  %s4201_s27 = smov 60  }
  0x22   :  { %337 = vrot.lane.b32.xlu0 %v336_v59, %s4187_s9  ;;  %v3435_v18 = vld [vmem:[%s7751_s0 + $0x13b] sm:$0x2]   ;;  %v3459_v59 = vld [vmem:[%s7751_s0 + $0xf4] sm:$0x80]   ;;  %v536_v8 = vsel %vm21_vm4, %v3457_v54, %v532_v3  ;;  %v3492_v54 = vld [vmem:[%s7751_s0 + $0x1d4] sm:$0x40]  }
  0x23   :  { %v3436_v19 = vld [vmem:[%s7751_s0 + $0x15a] sm:$0x4]   ;;  %v450_v23 = vsel %vm5_vm0, %v3435_v18, %v3434_v15  ;;  %441 = vrot.lane.b32.xlu1 %v440_v38, %s4188_s28  ;;  %v3460_v60 = vld [vmem:[%s7751_s0 + $0x11b] sm:$0x1]   ;;  %v540_v13 = vsel %vm25_vm5, %v3458_v58, %v536_v8  ;;  %v3501_v3 = vld [vmem:[%s7751_s0 + $0x2d4] sm:$0x40]  }
  0x24   :  { %v3437_v20 = vld [vmem:[%s7751_s0 + $0x179] sm:$0x8]   ;;  %v454_v28 = vsel %vm9_vm1, %v3436_v19, %v450_v23  ;;  %v3461_v63 = vld [vmem:[%s7751_s0 + $0x13a] sm:$0x2]   ;;  %v544_v19 = vsel %vm29_vm6, %v3459_v59, %v540_v13  ;;  %v3496_v59 = vld [vmem:[%s7751_s0 + $0x239] sm:$0x2]  }
  0x25   :  { %v3438_v24 = vld [vmem:[%s7751_s0 + $0x198] sm:$0x10]   ;;  %v458_v33 = vsel %vm13_vm2, %v3437_v20, %v454_v28  ;;  %v3462_v0 = vld [vmem:[%s7751_s0 + $0x159] sm:$0x4]   ;;  %v554_v4 = vsel %vm5_vm0, %v3461_v63, %v3460_v60  ;;  %v3479_v28 = vld [vmem:[%s7751_s0 + $0x39] sm:$0x2]  }
  0x26   :  { %v3439_v25 = vld [vmem:[%s7751_s0 + $0x1b7] sm:$0x20]   ;;  %406 = vrot.lane.b32.xlu0 %v405_v21, %s4187_s9  ;;  %v462_v39 = vsel %vm17_vm3, %v3438_v24, %v458_v33  ;;  %v3463_v1 = vld [vmem:[%s7751_s0 + $0x178] sm:$0x8]   ;;  %v558_v9 = vsel %vm9_vm1, %v3462_v0, %v554_v4  ;;  %v624_v32 = vsel %vm5_vm0, %v3479_v28, %v3478_v27  ;;  %v3481_v33 = vld [vmem:[%s7751_s0 + $0x77] sm:$0x8]  }
  0x27   :  { %v3440_v26 = vld [vmem:[%s7751_s0 + $0x1d6] sm:$0x40]   ;;  %v466_v44 = vsel %vm21_vm4, %v3439_v25, %v462_v39  ;;  %v3464_v5 = vld [vmem:[%s7751_s0 + $0x197] sm:$0x10]   ;;  %v562_v14 = vsel %vm13_vm2, %v3463_v1, %v558_v9  ;;  %v3484_v39 = vld [vmem:[%s7751_s0 + $0xd4] sm:$0x40]  }
  0x28   :  { %v3441_v29 = vld [vmem:[%s7751_s0 + $0x1f5] sm:$0x80]   ;;  %v470_v49 = vsel %vm25_vm5, %v3440_v26, %v466_v44  ;;  %v3465_v6 = vld [vmem:[%s7751_s0 + $0x1b6] sm:$0x20]   ;;  %v566_v20 = vsel %vm17_vm3, %v3464_v5, %v562_v14  ;;  %v3487_v44 = vld [vmem:[%s7751_s0 + $0x139] sm:$0x2]  }
  0x29   :  { %v3443_v30 = vld [vmem:[%s7751_s0 + $0x21c] sm:$0x1]   ;;  %v474_v55 = vsel %vm29_vm6, %v3441_v29, %v470_v49  ;;  %v3466_v7 = vld [vmem:[%s7751_s0 + $0x1d5] sm:$0x40]   ;;  %v570_v25 = vsel %vm21_vm4, %v3465_v6, %v566_v20  ;;  %v3480_v29 = vld [vmem:[%s7751_s0 + $0x58] sm:$0x4]  }
  0x2a   :  { %v3444_v31 = vld [vmem:[%s7751_s0 + $0x23b] sm:$0x2]   ;;  %475 = vrot.lane.b32.xlu0 %v474_v55, %s4188_s28  ;;  %v3467_v10 = vld [vmem:[%s7751_s0 + $0x1f4] sm:$0x80]   ;;  %v628_v38 = vsel %vm9_vm1, %v3480_v29, %v624_v32  ;;  %v3489_v49 = vld [vmem:[%s7751_s0 + $0x177] sm:$0x8]  }
  0x2b   :  { %v485_v34 = vsel %vm5_vm0, %v3444_v31, %v3443_v30  ;;  %v3445_v35 = vld [vmem:[%s7751_s0 + $0x25a] sm:$0x4]   ;;  %v3469_v11 = vld [vmem:[%s7751_s0 + $0x21b] sm:$0x1]   ;;  %v574_v30 = vsel %vm25_vm5, %v3466_v7, %v570_v25  ;;  %v3493_v55 = vld [vmem:[%s7751_s0 + $0x1f3] sm:$0x80]  }
  0x2c   :  { %v3446_v36 = vld [vmem:[%s7751_s0 + $0x279] sm:$0x8]   ;;  %v489_v40 = vsel %vm9_vm1, %v3445_v35, %v485_v34  ;;  %v3470_v12 = vld [vmem:[%s7751_s0 + $0x23a] sm:$0x2]   ;;  %v3482_v34 = vld [vmem:[%s7751_s0 + $0x96] sm:$0x10]  }
  0x2d   :  { %v3447_v37 = vld [vmem:[%s7751_s0 + $0x298] sm:$0x10]   ;;  %v493_v45 = vsel %vm13_vm2, %v3446_v36, %v489_v40  ;;  %v589_v15 = vsel %vm5_vm0, %v3470_v12, %v3469_v11  ;;  %v3471_v16 = vld [vmem:[%s7751_s0 + $0x259] sm:$0x4]   ;;  %v3483_v35 = vld [vmem:[%s7751_s0 + $0xb5] sm:$0x20]   ;;  %v578_v36 = vsel %vm29_vm6, %v3467_v10, %v574_v30 }
  0x2e   :  { %v3448_v41 = vld [vmem:[%s7751_s0 + $0x2b7] sm:$0x20]   ;;  %v497_v50 = vsel %vm17_vm3, %v3447_v37, %v493_v45  ;;  %v3472_v17 = vld [vmem:[%s7751_s0 + $0x278] sm:$0x8]   ;;  %v593_v21 = vsel %vm9_vm1, %v3471_v16, %v589_v15  ;;  %545 = vrot.lane.b32.xlu0 %v544_v19, %s4189_s19  ;;  %v3485_v40 = vld [vmem:[%s7751_s0 + $0xf3] sm:$0x80]  }
  0x2f   :  { %v3449_v42 = vld [vmem:[%s7751_s0 + $0x2d6] sm:$0x40]   ;;  %v501_v56 = vsel %vm21_vm4, %v3448_v41, %v497_v50  ;;  %v3473_v18 = vld [vmem:[%s7751_s0 + $0x297] sm:$0x10]   ;;  %v597_v26 = vsel %vm13_vm2, %v3472_v17, %v593_v21  ;;  %v3488_v45 = vld [vmem:[%s7751_s0 + $0x158] sm:$0x4]  }
  0x30   :  { %v3450_v43 = vld [vmem:[%s7751_s0 + $0x2f5] sm:$0x80]   ;;  %v505_v61 = vsel %vm25_vm5, %v3449_v42, %v501_v56  ;;  %v3474_v22 = vld [vmem:[%s7751_s0 + $0x2b6] sm:$0x20]   ;;  %v601_v31 = vsel %vm17_vm3, %v3473_v18, %v597_v26  ;;  %v632_v42 = vsel %vm13_vm2, %v3481_v33, %v628_v38  ;;  %v3490_v50 = vld [vmem:[%s7751_s0 + $0x196] sm:$0x10]  }
  0x31   :  { %v509_v2 = vsel %vm29_vm6, %v3450_v43, %v505_v61  ;;  %v3475_v23 = vld [vmem:[%s7751_s0 + $0x2d5] sm:$0x40]   ;;  %v605_v37 = vsel %vm21_vm4, %v3474_v22, %v601_v31  ;;  %v3486_v43 = vld [vmem:[%s7751_s0 + $0x11a] sm:$0x1]   ;;  %v636_v47 = vsel %vm17_vm3, %v3482_v34, %v632_v42  ;;  %v3504_v7 = vld [vmem:[%s7751_s0 + $0x19] sm:$0x1]  }
  0x32   :  { %510 = vrot.lane.b32.xlu1 %v509_v2, %s4188_s28  ;;  %v3476_v24 = vld [vmem:[%s7751_s0 + $0x2f4] sm:$0x80]   ;;  %v609_v41 = vsel %vm25_vm5, %v3475_v23, %v605_v37  ;;  %v658_v48 = vsel %vm5_vm0, %v3487_v44, %v3486_v43  ;;  %v640_v52 = vsel %vm21_vm4, %v3483_v35, %v636_v47  ;;  %v3495_v56 = vld [vmem:[%s7751_s0 + $0x21a] sm:$0x1]   ;;  %v3505_v8 = vld [vmem:[%s7751_s0 + $0x38] sm:$0x2]  }
  0x33   :  { %v613_v46 = vsel %vm29_vm6, %v3476_v24, %v609_v41  ;;  %v662_v53 = vsel %vm9_vm1, %v3488_v45, %v658_v48  ;;  %v644_v57 = vsel %vm25_vm5, %v3484_v39, %v640_v52  ;;  %v3497_v60 = vld [vmem:[%s7751_s0 + $0x258] sm:$0x4]   ;;  %v693_v0 = vsel %vm5_vm0, %v3496_v59, %v3495_v56  ;;  %v3506_v12 = vld [vmem:[%s7751_s0 + $0x57] sm:$0x4]   ;;  %v3530_v52 = vld [vmem:[%s7751_s0 + $0x18] sm:$0x1]  }
  0x34   :  { %614 = vrot.lane.b32.xlu0 %v613_v46, %s4189_s19  ;;  %v666_v58 = vsel %vm13_vm2, %v3489_v49, %v662_v53  ;;  %v3498_v61 = vld [vmem:[%s7751_s0 + $0x277] sm:$0x8]   ;;  %v648_v62 = vsel %vm29_vm6, %v3485_v40, %v644_v57  ;;  %v697_v5 = vsel %vm9_vm1, %v3497_v60, %v693_v0  ;;  %v728_v11 = vsel %vm5_vm0, %v3505_v8, %v3504_v7  ;;  %v3507_v13 = vld [vmem:[%s7751_s0 + $0x76] sm:$0x8]   ;;  %v3531_v53 = vld [vmem:[%s7751_s0 + $0x37] sm:$0x2]  }
  0x35   :  { %v670_v63 = vsel %vm17_vm3, %v3490_v50, %v666_v58  ;;  %v3499_v1 = vld [vmem:[%s7751_s0 + $0x296] sm:$0x10]   ;;  %v701_v10 = vsel %vm13_vm2, %v3498_v61, %v697_v5  ;;  %v3508_v14 = vld [vmem:[%s7751_s0 + $0x95] sm:$0x10]   ;;  %v732_v17 = vsel %vm9_vm1, %v3506_v12, %v728_v11  ;;  %v832_v56 = vsel %vm5_vm0, %v3531_v53, %v3530_v52  ;;  %v3532_v57 = vld [vmem:[%s7751_s0 + $0x56] sm:$0x4]  }
  0x36   :  { %579 = vrot.lane.b32.xlu1 %v578_v36, %s4189_s19  ;;  %v3500_v2 = vld [vmem:[%s7751_s0 + $0x2b5] sm:$0x20]   ;;  %v674_v4 = vsel %vm21_vm4, %v3491_v51, %v670_v63  ;;  %v705_v16 = vsel %vm17_vm3, %v3499_v1, %v701_v10  ;;  %v3509_v18 = vld [vmem:[%s7751_s0 + $0xb4] sm:$0x20]   ;;  %v736_v22 = vsel %vm13_vm2, %v3507_v13, %v732_v17  ;;  %v3533_v58 = vld [vmem:[%s7751_s0 + $0x75] sm:$0x8]  }
  0x37   :  { %v3502_v6 = vld [vmem:[%s7751_s0 + $0x2f3] sm:$0x80]   ;;  %v678_v9 = vsel %vm25_vm5, %v3492_v54, %v674_v4  ;;  %v3510_v19 = vld [vmem:[%s7751_s0 + $0xd3] sm:$0x40]   ;;  %v709_v21 = vsel %vm21_vm4, %v3500_v2, %v705_v16  ;;  %v740_v27 = vsel %vm17_vm3, %v3508_v14, %v736_v22  ;;  %v3534_v59 = vld [vmem:[%s7751_s0 + $0x94] sm:$0x10]  }
  0x38   :  { %v682_v15 = vsel %vm29_vm6, %v3493_v55, %v678_v9  ;;  %v3511_v20 = vld [vmem:[%s7751_s0 + $0xf2] sm:$0x80]   ;;  %v713_v26 = vsel %vm25_vm5, %v3501_v3, %v709_v21  ;;  %v744_v33 = vsel %vm21_vm4, %v3509_v18, %v740_v27  ;;  %v3535_v63 = vld [vmem:[%s7751_s0 + $0xb3] sm:$0x20]   ;;  %v3566_v53 = vld [vmem:[%s7751_s0 + $0x155] sm:$0x4]  }
  0x39   :  { %683 = vrot.lane.b32.xlu0 %v682_v15, %s4190_s7  ;;  %v3512_v23 = vld [vmem:[%s7751_s0 + $0x119] sm:$0x1]   ;;  %v717_v32 = vsel %vm29_vm6, %v3502_v6, %v713_v26  ;;  %v748_v38 = vsel %vm25_vm5, %v3510_v19, %v744_v33  ;;  %v3536_v0 = vld [vmem:[%s7751_s0 + $0xd2] sm:$0x40]   ;;  %v3556_v33 = vld [vmem:[%s7751_s0 + $0x17] sm:$0x1]  }
  0x3a   :  { %649 = vrot.lane.b32.xlu1 %v648_v62, %s4190_s7  ;;  %v3513_v24 = vld [vmem:[%s7751_s0 + $0x138] sm:$0x2]   ;;  %v752_v43 = vsel %vm29_vm6, %v3511_v20, %v748_v38  ;;  %v836_v62 = vsel %vm9_vm1, %v3532_v57, %v832_v56  ;;  %v3537_v1 = vld [vmem:[%s7751_s0 + $0xf1] sm:$0x80]   ;;  %v3559_v38 = vld [vmem:[%s7751_s0 + $0x74] sm:$0x8]  }
  0x3b   :  { %v3514_v25 = vld [vmem:[%s7751_s0 + $0x157] sm:$0x4]   ;;  %v762_v28 = vsel %vm5_vm0, %v3513_v24, %v3512_v23  ;;  %v840_v3 = vsel %vm13_vm2, %v3533_v58, %v836_v62  ;;  %v3538_v4 = vld [vmem:[%s7751_s0 + $0x118] sm:$0x1]   ;;  %s4202_s17 = smov 56   ;;  %s4203_s9 = smov 52  }
  0x3c   :  { %v3515_v29 = vld [vmem:[%s7751_s0 + $0x176] sm:$0x8]   ;;  %v766_v34 = vsel %vm9_vm1, %v3514_v25, %v762_v28  ;;  %v3539_v5 = vld [vmem:[%s7751_s0 + $0x137] sm:$0x2]   ;;  %v844_v7 = vsel %vm17_vm3, %v3534_v59, %v840_v3  ;;  %v3569_v59 = vld [vmem:[%s7751_s0 + $0x1b2] sm:$0x20]  }
  0x3d   :  { %v3516_v30 = vld [vmem:[%s7751_s0 + $0x195] sm:$0x10]   ;;  %v770_v39 = vsel %vm13_vm2, %v3515_v29, %v766_v34  ;;  %753 = vrot.lane.b32.xlu0 %v752_v43, %s4191_s29  ;;  %v866_v8 = vsel %vm5_vm0, %v3539_v5, %v3538_v4  ;;  %v3540_v9 = vld [vmem:[%s7751_s0 + $0x156] sm:$0x4]   ;;  %v848_v13 = vsel %vm21_vm4, %v3535_v63, %v844_v7  ;;  %v3561_v43 = vld [vmem:[%s7751_s0 + $0xb2] sm:$0x20]  }
  0x3e   :  { %v3517_v31 = vld [vmem:[%s7751_s0 + $0x1b4] sm:$0x20]   ;;  %718 = vrot.lane.b32.xlu1 %v717_v32, %s4190_s7  ;;  %v774_v44 = vsel %vm17_vm3, %v3516_v30, %v770_v39  ;;  %v3541_v10 = vld [vmem:[%s7751_s0 + $0x175] sm:$0x8]   ;;  %v870_v14 = vsel %vm9_vm1, %v3540_v9, %v866_v8  ;;  %v852_v18 = vsel %vm25_vm5, %v3536_v0, %v848_v13  ;;  %v3573_v0 = vld [vmem:[%s7751_s0 + $0x217] sm:$0x1]  }
  0x3f   :  { %v3518_v35 = vld [vmem:[%s7751_s0 + $0x1d3] sm:$0x40]   ;;  %v778_v49 = vsel %vm21_vm4, %v3517_v31, %v774_v44  ;;  %v3542_v11 = vld [vmem:[%s7751_s0 + $0x194] sm:$0x10]   ;;  %v874_v19 = vsel %vm13_vm2, %v3541_v10, %v870_v14  ;;  %v856_v23 = vsel %vm29_vm6, %v3537_v1, %v852_v18  ;;  %v3562_v44 = vld [vmem:[%s7751_s0 + $0xd1] sm:$0x40]  }
  0x40   :  { %v3519_v36 = vld [vmem:[%s7751_s0 + $0x1f2] sm:$0x80]   ;;  %v782_v54 = vsel %vm25_vm5, %v3518_v35, %v778_v49  ;;  %v3543_v15 = vld [vmem:[%s7751_s0 + $0x1b3] sm:$0x20]   ;;  %v878_v24 = vsel %vm17_vm3, %v3542_v11, %v874_v19  ;;  %v3565_v49 = vld [vmem:[%s7751_s0 + $0x136] sm:$0x2]  }
  0x41   :  { %v3521_v37 = vld [vmem:[%s7751_s0 + $0x219] sm:$0x1]   ;;  %v786_v60 = vsel %vm29_vm6, %v3519_v36, %v782_v54  ;;  %v3544_v16 = vld [vmem:[%s7751_s0 + $0x1d2] sm:$0x40]   ;;  %v882_v29 = vsel %vm21_vm4, %v3543_v15, %v878_v24  ;;  %v3557_v36 = vld [vmem:[%s7751_s0 + $0x36] sm:$0x2]  }
  0x42   :  { %v3522_v40 = vld [vmem:[%s7751_s0 + $0x238] sm:$0x2]   ;;  %787 = vrot.lane.b32.xlu1 %v786_v60, %s4191_s29  ;;  %v3545_v17 = vld [vmem:[%s7751_s0 + $0x1f1] sm:$0x80]   ;;  %v886_v34 = vsel %vm25_vm5, %v3544_v16, %v882_v29  ;;  %v3567_v54 = vld [vmem:[%s7751_s0 + $0x174] sm:$0x8]  }
  0x43   :  { %v3523_v41 = vld [vmem:[%s7751_s0 + $0x257] sm:$0x4]   ;;  %v797_v45 = vsel %vm5_vm0, %v3522_v40, %v3521_v37  ;;  %v3547_v20 = vld [vmem:[%s7751_s0 + $0x218] sm:$0x1]   ;;  %v3558_v37 = vld [vmem:[%s7751_s0 + $0x55] sm:$0x4]   ;;  %v890_v39 = vsel %vm29_vm6, %v3545_v17, %v886_v34 }
  0x44   :  { %v3524_v42 = vld [vmem:[%s7751_s0 + $0x276] sm:$0x8]   ;;  %v801_v50 = vsel %vm9_vm1, %v3523_v41, %v797_v45  ;;  %v3548_v21 = vld [vmem:[%s7751_s0 + $0x237] sm:$0x2]   ;;  %v936_v41 = vsel %vm5_vm0, %v3557_v36, %v3556_v33  ;;  %v3570_v60 = vld [vmem:[%s7751_s0 + $0x1d1] sm:$0x40]  }
  0x45   :  { %v3525_v46 = vld [vmem:[%s7751_s0 + $0x295] sm:$0x10]   ;;  %v805_v55 = vsel %vm13_vm2, %v3524_v42, %v801_v50  ;;  %v3549_v22 = vld [vmem:[%s7751_s0 + $0x256] sm:$0x4]   ;;  %v901_v25 = vsel %vm5_vm0, %v3548_v21, %v3547_v20  ;;  %v3560_v42 = vld [vmem:[%s7751_s0 + $0x93] sm:$0x10]  }
  0x46   :  { %v3526_v47 = vld [vmem:[%s7751_s0 + $0x2b4] sm:$0x20]   ;;  %v809_v61 = vsel %vm17_vm3, %v3525_v46, %v805_v55  ;;  %v3550_v26 = vld [vmem:[%s7751_s0 + $0x275] sm:$0x8]   ;;  %857 = vrot.lane.b32.xlu1 %v856_v23, %s4192_s16  ;;  %v905_v30 = vsel %vm9_vm1, %v3549_v22, %v901_v25  ;;  %v940_v46 = vsel %vm9_vm1, %v3558_v37, %v936_v41  ;;  %v3568_v55 = vld [vmem:[%s7751_s0 + $0x193] sm:$0x10]  }
  0x47   :  { %v3527_v48 = vld [vmem:[%s7751_s0 + $0x2d3] sm:$0x40]   ;;  %v813_v2 = vsel %vm21_vm4, %v3526_v47, %v809_v61  ;;  %v3551_v27 = vld [vmem:[%s7751_s0 + $0x294] sm:$0x10]   ;;  %v909_v35 = vsel %vm13_vm2, %v3550_v26, %v905_v30  ;;  %v3563_v47 = vld [vmem:[%s7751_s0 + $0xf0] sm:$0x80]  }
  0x48   :  { %v3528_v51 = vld [vmem:[%s7751_s0 + $0x2f2] sm:$0x80]   ;;  %v817_v6 = vsel %vm25_vm5, %v3527_v48, %v813_v2  ;;  %v3552_v28 = vld [vmem:[%s7751_s0 + $0x2b3] sm:$0x20]   ;;  %v913_v40 = vsel %vm17_vm3, %v3551_v27, %v909_v35  ;;  %v3564_v48 = vld [vmem:[%s7751_s0 + $0x117] sm:$0x1]  }
  0x49   :  { %v821_v12 = vsel %vm29_vm6, %v3528_v51, %v817_v6  ;;  %v3553_v31 = vld [vmem:[%s7751_s0 + $0x2d2] sm:$0x40]   ;;  %v917_v45 = vsel %vm21_vm4, %v3552_v28, %v913_v40  ;;  %v944_v51 = vsel %vm13_vm2, %v3559_v38, %v940_v46  ;;  %v970_v52 = vsel %vm5_vm0, %v3565_v49, %v3564_v48  ;;  %v3571_v61 = vld [vmem:[%s7751_s0 + $0x1f0] sm:$0x80]   ;;  %v3582_v14 = vld [vmem:[%s7751_s0 + $0x16] sm:$0x1]  }
  0x4a   :  { %822 = vrot.lane.b32.xlu0 %v821_v12, %s4191_s29  ;;  %v3554_v32 = vld [vmem:[%s7751_s0 + $0x2f1] sm:$0x80]   ;;  %v921_v50 = vsel %vm25_vm5, %v3553_v31, %v917_v45  ;;  %v948_v57 = vsel %vm17_vm3, %v3560_v42, %v944_v51  ;;  %v974_v58 = vsel %vm9_vm1, %v3566_v53, %v970_v52  ;;  %v3574_v1 = vld [vmem:[%s7751_s0 + $0x236] sm:$0x2]   ;;  %v3583_v17 = vld [vmem:[%s7751_s0 + $0x35] sm:$0x2]  }
  0x4b   :  { %v925_v56 = vsel %vm29_vm6, %v3554_v32, %v921_v50  ;;  %v952_v62 = vsel %vm21_vm4, %v3561_v43, %v948_v57  ;;  %v978_v63 = vsel %vm13_vm2, %v3567_v54, %v974_v58  ;;  %v3575_v2 = vld [vmem:[%s7751_s0 + $0x255] sm:$0x4]   ;;  %v1005_v5 = vsel %vm5_vm0, %v3574_v1, %v3573_v0  ;;  %v3584_v18 = vld [vmem:[%s7751_s0 + $0x54] sm:$0x4]   ;;  %s4204_s19 = smov 48   ;;  %s4205_s28 = smov 44  }
  0x4c   :  { %926 = vrot.lane.b32.xlu1 %v925_v56, %s4192_s16  ;;  %v956_v3 = vsel %vm25_vm5, %v3562_v44, %v952_v62  ;;  %v982_v4 = vsel %vm17_vm3, %v3568_v55, %v978_v63  ;;  %v3576_v6 = vld [vmem:[%s7751_s0 + $0x274] sm:$0x8]   ;;  %v1009_v11 = vsel %vm9_vm1, %v3575_v2, %v1005_v5  ;;  %v3585_v19 = vld [vmem:[%s7751_s0 + $0x73] sm:$0x8]   ;;  %v1040_v22 = vsel %vm5_vm0, %v3583_v17, %v3582_v14  ;;  %v3610_v62 = vld [vmem:[%s7751_s0 + $0x53] sm:$0x4]  }
  0x4d   :  { %v3577_v7 = vld [vmem:[%s7751_s0 + $0x293] sm:$0x10]   ;;  %v960_v9 = vsel %vm29_vm6, %v3563_v47, %v956_v3  ;;  %v986_v10 = vsel %vm21_vm4, %v3569_v59, %v982_v4  ;;  %v1013_v16 = vsel %vm13_vm2, %v3576_v6, %v1009_v11  ;;  %v3586_v23 = vld [vmem:[%s7751_s0 + $0x92] sm:$0x10]   ;;  %v1044_v27 = vsel %vm9_vm1, %v3584_v18, %v1040_v22  ;;  %v3611_v2 = vld [vmem:[%s7751_s0 + $0x72] sm:$0x8]  }
  0x4e   :  { %891 = vrot.lane.b32.xlu0 %v890_v39, %s4192_s16  ;;  %v3578_v8 = vld [vmem:[%s7751_s0 + $0x2b2] sm:$0x20]   ;;  %v990_v15 = vsel %vm25_vm5, %v3570_v60, %v986_v10  ;;  %v1017_v21 = vsel %vm17_vm3, %v3577_v7, %v1013_v16  ;;  %v3587_v24 = vld [vmem:[%s7751_s0 + $0xb1] sm:$0x20]   ;;  %v1048_v31 = vsel %vm13_vm2, %v3585_v19, %v1044_v27  ;;  %v3608_v60 = vld [vmem:[%s7751_s0 + $0x15] sm:$0x1]  }
  0x4f   :  { %v3579_v12 = vld [vmem:[%s7751_s0 + $0x2d1] sm:$0x40]   ;;  %v994_v20 = vsel %vm29_vm6, %v3571_v61, %v990_v15  ;;  %v3588_v25 = vld [vmem:[%s7751_s0 + $0xd0] sm:$0x40]   ;;  %v1021_v26 = vsel %vm21_vm4, %v3578_v8, %v1017_v21  ;;  %v1052_v36 = vsel %vm17_vm3, %v3586_v23, %v1048_v31  ;;  %v3609_v61 = vld [vmem:[%s7751_s0 + $0x34] sm:$0x2]  }
  0x50   :  { %v3580_v13 = vld [vmem:[%s7751_s0 + $0x2f0] sm:$0x80]   ;;  %995 = vrot.lane.b32.xlu1 %v994_v20, %s4193_s14  ;;  %v3589_v28 = vld [vmem:[%s7751_s0 + $0xef] sm:$0x80]   ;;  %v1025_v30 = vsel %vm25_vm5, %v3579_v12, %v1021_v26  ;;  %v1056_v41 = vsel %vm21_vm4, %v3587_v24, %v1052_v36  ;;  %v1144_v1 = vsel %vm5_vm0, %v3609_v61, %v3608_v60  ;;  %v3612_v3 = vld [vmem:[%s7751_s0 + $0x91] sm:$0x10]  }
  0x51   :  { %v3590_v29 = vld [vmem:[%s7751_s0 + $0x116] sm:$0x1]   ;;  %v1029_v35 = vsel %vm29_vm6, %v3580_v13, %v1025_v30  ;;  %v1060_v46 = vsel %vm25_vm5, %v3588_v25, %v1056_v41  ;;  %v3613_v4 = vld [vmem:[%s7751_s0 + $0xb0] sm:$0x20]   ;;  %v1148_v7 = vsel %vm9_vm1, %v3610_v62, %v1144_v1  ;;  %v3634_v41 = vld [vmem:[%s7751_s0 + $0x14] sm:$0x1]  }
  0x52   :  { %961 = vrot.lane.b32.xlu0 %v960_v9, %s4193_s14  ;;  %v3591_v32 = vld [vmem:[%s7751_s0 + $0x135] sm:$0x2]   ;;  %v1064_v52 = vsel %vm29_vm6, %v3589_v28, %v1060_v46  ;;  %v3614_v8 = vld [vmem:[%s7751_s0 + $0xcf] sm:$0x40]   ;;  %v1152_v12 = vsel %vm13_vm2, %v3611_v2, %v1148_v7  ;;  %v3647_v1 = vld [vmem:[%s7751_s0 + $0x1af] sm:$0x20]  }
  0x53   :  { %v3592_v33 = vld [vmem:[%s7751_s0 + $0x154] sm:$0x4]   ;;  %v1074_v37 = vsel %vm5_vm0, %v3591_v32, %v3590_v29  ;;  %v3615_v9 = vld [vmem:[%s7751_s0 + $0xee] sm:$0x80]   ;;  %v1156_v17 = vsel %vm17_vm3, %v3612_v3, %v1152_v12  ;;  %vm31_vm7 = vcmask 31744   ;;  %vm131_vm8 = vcmask 1048544  }
  0x54   :  { %v3593_v34 = vld [vmem:[%s7751_s0 + $0x173] sm:$0x8]   ;;  %v1078_v42 = vsel %vm9_vm1, %v3592_v33, %v1074_v37  ;;  %1065 = vrot.lane.b32.xlu1 %v1064_v52, %s4194_s3  ;;  %v3616_v10 = vld [vmem:[%s7751_s0 + $0x115] sm:$0x1]   ;;  %v1160_v22 = vsel %vm21_vm4, %v3613_v4, %v1156_v17  ;;  %v3648_v4 = vld [vmem:[%s7751_s0 + $0x1ce] sm:$0x40]  }
  0x55   :  { %v3594_v38 = vld [vmem:[%s7751_s0 + $0x192] sm:$0x10]   ;;  %v1082_v47 = vsel %vm13_vm2, %v3593_v34, %v1078_v42  ;;  %v3617_v13 = vld [vmem:[%s7751_s0 + $0x134] sm:$0x2]   ;;  %v1164_v27 = vsel %vm25_vm5, %v3614_v8, %v1160_v22  ;;  %v3635_v42 = vld [vmem:[%s7751_s0 + $0x33] sm:$0x2]  }
  0x56   :  { %v3595_v39 = vld [vmem:[%s7751_s0 + $0x1b1] sm:$0x20]   ;;  %1030 = vrot.lane.b32.xlu0 %v1029_v35, %s4193_s14  ;;  %v1086_v53 = vsel %vm17_vm3, %v3594_v38, %v1082_v47  ;;  %v3618_v14 = vld [vmem:[%s7751_s0 + $0x153] sm:$0x4]   ;;  %v1178_v18 = vsel %vm5_vm0, %v3617_v13, %v3616_v10  ;;  %v1168_v33 = vsel %vm29_vm6, %v3615_v9, %v1164_v27  ;;  %v1248_v46 = vsel %vm5_vm0, %v3635_v42, %v3634_v41  ;;  %v3637_v47 = vld [vmem:[%s7751_s0 + $0x71] sm:$0x8]  }
  0x57   :  { %v3596_v40 = vld [vmem:[%s7751_s0 + $0x1d0] sm:$0x40]   ;;  %v1090_v58 = vsel %vm21_vm4, %v3595_v39, %v1086_v53  ;;  %v3619_v15 = vld [vmem:[%s7751_s0 + $0x172] sm:$0x8]   ;;  %v1182_v23 = vsel %vm9_vm1, %v3618_v14, %v1178_v18  ;;  %v3640_v53 = vld [vmem:[%s7751_s0 + $0xce] sm:$0x40]  }
  0x58   :  { %v3597_v43 = vld [vmem:[%s7751_s0 + $0x1ef] sm:$0x80]   ;;  %v1094_v63 = vsel %vm25_vm5, %v3596_v40, %v1090_v58  ;;  %v3620_v19 = vld [vmem:[%s7751_s0 + $0x191] sm:$0x10]   ;;  %v1186_v28 = vsel %vm13_vm2, %v3619_v15, %v1182_v23  ;;  %v3643_v58 = vld [vmem:[%s7751_s0 + $0x133] sm:$0x2]  }
  0x59   :  { %v3599_v44 = vld [vmem:[%s7751_s0 + $0x216] sm:$0x1]   ;;  %v1098_v5 = vsel %vm29_vm6, %v3597_v43, %v1094_v63  ;;  %v3621_v20 = vld [vmem:[%s7751_s0 + $0x1b0] sm:$0x20]   ;;  %v1190_v34 = vsel %vm17_vm3, %v3620_v19, %v1186_v28  ;;  %v3636_v43 = vld [vmem:[%s7751_s0 + $0x52] sm:$0x4]  }
  0x5a   :  { %v3600_v45 = vld [vmem:[%s7751_s0 + $0x235] sm:$0x2]   ;;  %1099 = vrot.lane.b32.xlu0 %v1098_v5, %s4194_s3  ;;  %v3622_v21 = vld [vmem:[%s7751_s0 + $0x1cf] sm:$0x40]   ;;  %v1194_v39 = vsel %vm21_vm4, %v3621_v20, %v1190_v34  ;;  %v1252_v52 = vsel %vm9_vm1, %v3636_v43, %v1248_v46  ;;  %v3645_v63 = vld [vmem:[%s7751_s0 + $0x171] sm:$0x8]  }
  0x5b   :  { %v1109_v48 = vsel %vm5_vm0, %v3600_v45, %v3599_v44  ;;  %v3601_v49 = vld [vmem:[%s7751_s0 + $0x254] sm:$0x4]   ;;  %v3623_v24 = vld [vmem:[%s7751_s0 + $0x1ee] sm:$0x80]   ;;  %v1198_v44 = vsel %vm25_vm5, %v3622_v21, %v1194_v39  ;;  %v3649_v5 = vld [vmem:[%s7751_s0 + $0x1ed] sm:$0x80]  }
  0x5c   :  { %v3602_v50 = vld [vmem:[%s7751_s0 + $0x273] sm:$0x8]   ;;  %v1113_v54 = vsel %vm9_vm1, %v3601_v49, %v1109_v48  ;;  %v3625_v25 = vld [vmem:[%s7751_s0 + $0x215] sm:$0x1]   ;;  %v3638_v48 = vld [vmem:[%s7751_s0 + $0x90] sm:$0x10]  }
  0x5d   :  { %v3603_v51 = vld [vmem:[%s7751_s0 + $0x292] sm:$0x10]   ;;  %v1117_v59 = vsel %vm13_vm2, %v3602_v50, %v1113_v54  ;;  %v3626_v26 = vld [vmem:[%s7751_s0 + $0x234] sm:$0x2]   ;;  %v3639_v49 = vld [vmem:[%s7751_s0 + $0xaf] sm:$0x20]   ;;  %v1202_v50 = vsel %vm29_vm6, %v3623_v24, %v1198_v44 }
  0x5e   :  { %v3604_v55 = vld [vmem:[%s7751_s0 + $0x2b1] sm:$0x20]   ;;  %v1121_v0 = vsel %vm17_vm3, %v3603_v51, %v1117_v59  ;;  %v1213_v29 = vsel %vm5_vm0, %v3626_v26, %v3625_v25  ;;  %v3627_v30 = vld [vmem:[%s7751_s0 + $0x253] sm:$0x4]   ;;  %1169 = vrot.lane.b32.xlu0 %v1168_v33, %s4195_s23  ;;  %v3641_v54 = vld [vmem:[%s7751_s0 + $0xed] sm:$0x80]  }
  0x5f   :  { %v3605_v56 = vld [vmem:[%s7751_s0 + $0x2d0] sm:$0x40]   ;;  %v1125_v6 = vsel %vm21_vm4, %v3604_v55, %v1121_v0  ;;  %v3628_v31 = vld [vmem:[%s7751_s0 + $0x272] sm:$0x8]   ;;  %v1217_v35 = vsel %vm9_vm1, %v3627_v30, %v1213_v29  ;;  %v3644_v59 = vld [vmem:[%s7751_s0 + $0x152] sm:$0x4]  }
  0x60   :  { %v3606_v57 = vld [vmem:[%s7751_s0 + $0x2ef] sm:$0x80]   ;;  %v1129_v11 = vsel %vm25_vm5, %v3605_v56, %v1125_v6  ;;  %v3629_v32 = vld [vmem:[%s7751_s0 + $0x291] sm:$0x10]   ;;  %v1221_v40 = vsel %vm13_vm2, %v3628_v31, %v1217_v35  ;;  %v1256_v56 = vsel %vm13_vm2, %v3637_v47, %v1252_v52  ;;  %v3646_v0 = vld [vmem:[%s7751_s0 + $0x190] sm:$0x10]  }
  0x61   :  { %v1133_v16 = vsel %vm29_vm6, %v3606_v57, %v1129_v11  ;;  %v3630_v36 = vld [vmem:[%s7751_s0 + $0x2b0] sm:$0x20]   ;;  %v1225_v45 = vsel %vm17_vm3, %v3629_v32, %v1221_v40  ;;  %v3642_v57 = vld [vmem:[%s7751_s0 + $0x114] sm:$0x1]   ;;  %v1260_v61 = vsel %vm17_vm3, %v3638_v48, %v1256_v56  ;;  %v3660_v21 = vld [vmem:[%s7751_s0 + $0x13] sm:$0x1]  }
  0x62   :  { %1134 = vrot.lane.b32.xlu1 %v1133_v16, %s4194_s3  ;;  %v3631_v37 = vld [vmem:[%s7751_s0 + $0x2cf] sm:$0x40]   ;;  %v1229_v51 = vsel %vm21_vm4, %v3630_v36, %v1225_v45  ;;  %v1282_v62 = vsel %vm5_vm0, %v3643_v58, %v3642_v57  ;;  %v1264_v2 = vsel %vm21_vm4, %v3639_v49, %v1260_v61  ;;  %v3651_v6 = vld [vmem:[%s7751_s0 + $0x214] sm:$0x1]   ;;  %v3661_v22 = vld [vmem:[%s7751_s0 + $0x32] sm:$0x2]  }
  0x63   :  { %v3632_v38 = vld [vmem:[%s7751_s0 + $0x2ee] sm:$0x80]   ;;  %v1233_v55 = vsel %vm25_vm5, %v3631_v37, %v1229_v51  ;;  %v1286_v3 = vsel %vm9_vm1, %v3644_v59, %v1282_v62  ;;  %v1268_v7 = vsel %vm25_vm5, %v3640_v53, %v1264_v2  ;;  %v3652_v9 = vld [vmem:[%s7751_s0 + $0x233] sm:$0x2]   ;;  %v1352_v25 = vsel %vm5_vm0, %v3661_v22, %v3660_v21  ;;  %v3662_v26 = vld [vmem:[%s7751_s0 + $0x51] sm:$0x4]  }
  0x64   :  { %v1237_v60 = vsel %vm29_vm6, %v3632_v38, %v1233_v55  ;;  %v1290_v8 = vsel %vm13_vm2, %v3645_v63, %v1286_v3  ;;  %v3653_v10 = vld [vmem:[%s7751_s0 + $0x252] sm:$0x4]   ;;  %v1272_v12 = vsel %vm29_vm6, %v3641_v54, %v1268_v7  ;;  %v1317_v14 = vsel %vm5_vm0, %v3652_v9, %v3651_v6  ;;  %v3663_v27 = vld [vmem:[%s7751_s0 + $0x70] sm:$0x8]   ;;  %v3686_v2 = vld [vmem:[%s7751_s0 + $0x12] sm:$0x1]  }
  0x65   :  { %1238 = vrot.lane.b32.xlu0 %v1237_v60, %s4195_s23  ;;  %v3654_v11 = vld [vmem:[%s7751_s0 + $0x271] sm:$0x8]   ;;  %v1294_v13 = vsel %vm17_vm3, %v3646_v0, %v1290_v8  ;;  %v1321_v19 = vsel %vm9_vm1, %v3653_v10, %v1317_v14  ;;  %v3664_v28 = vld [vmem:[%s7751_s0 + $0x8f] sm:$0x10]   ;;  %v1356_v31 = vsel %vm9_vm1, %v3662_v26, %v1352_v25  ;;  %v3687_v3 = vld [vmem:[%s7751_s0 + $0x31] sm:$0x2]  }
  0x66   :  { %1203 = vrot.lane.b32.xlu1 %v1202_v50, %s4195_s23  ;;  %v3655_v15 = vld [vmem:[%s7751_s0 + $0x290] sm:$0x10]   ;;  %v1298_v18 = vsel %vm21_vm4, %v3647_v1, %v1294_v13  ;;  %v1325_v24 = vsel %vm13_vm2, %v3654_v11, %v1321_v19  ;;  %v3665_v32 = vld [vmem:[%s7751_s0 + $0xae] sm:$0x20]   ;;  %v1360_v36 = vsel %vm13_vm2, %v3663_v27, %v1356_v31  ;;  %v1456_v6 = vsel %vm5_vm0, %v3687_v3, %v3686_v2  ;;  %v3688_v7 = vld [vmem:[%s7751_s0 + $0x50] sm:$0x4]  }
  0x67   :  { %v3656_v16 = vld [vmem:[%s7751_s0 + $0x2af] sm:$0x20]   ;;  %v1302_v23 = vsel %vm25_vm5, %v3648_v4, %v1298_v18  ;;  %v1329_v30 = vsel %vm17_vm3, %v3655_v15, %v1325_v24  ;;  %v3666_v33 = vld [vmem:[%s7751_s0 + $0xcd] sm:$0x40]   ;;  %v1364_v41 = vsel %vm17_vm3, %v3664_v28, %v1360_v36  ;;  %v3689_v8 = vld [vmem:[%s7751_s0 + $0x6f] sm:$0x8]  }
  0x68   :  { %v3657_v17 = vld [vmem:[%s7751_s0 + $0x2ce] sm:$0x40]   ;;  %v1306_v29 = vsel %vm29_vm6, %v3649_v5, %v1302_v23  ;;  %v3667_v34 = vld [vmem:[%s7751_s0 + $0xec] sm:$0x80]   ;;  %v1333_v35 = vsel %vm21_vm4, %v3656_v16, %v1329_v30  ;;  %v1368_v47 = vsel %vm21_vm4, %v3665_v32, %v1364_v41  ;;  %v3690_v9 = vld [vmem:[%s7751_s0 + $0x8e] sm:$0x10]  }
  0x69   :  { %v3658_v20 = vld [vmem:[%s7751_s0 + $0x2ed] sm:$0x80]   ;;  %1307 = vrot.lane.b32.xlu0 %v1306_v29, %s4196_s12  ;;  %v3668_v37 = vld [vmem:[%s7751_s0 + $0x113] sm:$0x1]   ;;  %v1337_v40 = vsel %vm25_vm5, %v3657_v17, %v1333_v35  ;;  %v1372_v52 = vsel %vm25_vm5, %v3666_v33, %v1368_v47  ;;  %v3691_v13 = vld [vmem:[%s7751_s0 + $0xad] sm:$0x20]  }
  0x6a   :  { %1273 = vrot.lane.b32.xlu1 %v1272_v12, %s4196_s12  ;;  %v3669_v38 = vld [vmem:[%s7751_s0 + $0x132] sm:$0x2]   ;;  %v1341_v46 = vsel %vm29_vm6, %v3658_v20, %v1337_v40  ;;  %v1376_v57 = vsel %vm29_vm6, %v3667_v34, %v1372_v52  ;;  %v1460_v12 = vsel %vm9_vm1, %v3688_v7, %v1456_v6  ;;  %v3692_v14 = vld [vmem:[%s7751_s0 + $0xcc] sm:$0x40]   ;;  %v3712_v47 = vld [vmem:[%s7751_s0 + $0x11] sm:$0x1]  }
  0x6b   :  { %v3670_v39 = vld [vmem:[%s7751_s0 + $0x151] sm:$0x4]   ;;  %v1386_v42 = vsel %vm5_vm0, %v3669_v38, %v3668_v37  ;;  %v3693_v15 = vld [vmem:[%s7751_s0 + $0xeb] sm:$0x80]   ;;  %v1464_v17 = vsel %vm13_vm2, %v3689_v8, %v1460_v12  ;;  %v3715_v52 = vld [vmem:[%s7751_s0 + $0x6e] sm:$0x8]  }
  0x6c   :  { %v3671_v43 = vld [vmem:[%s7751_s0 + $0x170] sm:$0x8]   ;;  %v1390_v48 = vsel %vm9_vm1, %v3670_v39, %v1386_v42  ;;  %v3694_v18 = vld [vmem:[%s7751_s0 + $0x112] sm:$0x1]   ;;  %v1468_v21 = vsel %vm17_vm3, %v3690_v9, %v1464_v17  ;;  %v3722_v3 = vld [vmem:[%s7751_s0 + $0x14f] sm:$0x4]  }
  0x6d   :  { %v3672_v44 = vld [vmem:[%s7751_s0 + $0x18f] sm:$0x10]   ;;  %v1394_v53 = vsel %vm13_vm2, %v3671_v43, %v1390_v48  ;;  %1377 = vrot.lane.b32.xlu0 %v1376_v57, %s4197_s4  ;;  %v3695_v19 = vld [vmem:[%s7751_s0 + $0x131] sm:$0x2]   ;;  %v1472_v27 = vsel %vm21_vm4, %v3691_v13, %v1468_v21  ;;  %v3717_v57 = vld [vmem:[%s7751_s0 + $0xac] sm:$0x20]  }
  0x6e   :  { %v3673_v45 = vld [vmem:[%s7751_s0 + $0x1ae] sm:$0x20]   ;;  %1342 = vrot.lane.b32.xlu1 %v1341_v46, %s4196_s12  ;;  %v1398_v58 = vsel %vm17_vm3, %v3672_v44, %v1394_v53  ;;  %v1490_v22 = vsel %vm5_vm0, %v3695_v19, %v3694_v18  ;;  %v3696_v23 = vld [vmem:[%s7751_s0 + $0x150] sm:$0x4]   ;;  %v1476_v32 = vsel %vm25_vm5, %v3692_v14, %v1472_v27  ;;  %v3725_v9 = vld [vmem:[%s7751_s0 + $0x1ac] sm:$0x20]  }
  0x6f   :  { %v3674_v49 = vld [vmem:[%s7751_s0 + $0x1cd] sm:$0x40]   ;;  %v1402_v63 = vsel %vm21_vm4, %v3673_v45, %v1398_v58  ;;  %v3697_v24 = vld [vmem:[%s7751_s0 + $0x16f] sm:$0x8]   ;;  %v1494_v28 = vsel %vm9_vm1, %v3696_v23, %v1490_v22  ;;  %v1480_v37 = vsel %vm29_vm6, %v3693_v15, %v1476_v32  ;;  %v3718_v58 = vld [vmem:[%s7751_s0 + $0xcb] sm:$0x40]  }
  0x70   :  { %v3675_v50 = vld [vmem:[%s7751_s0 + $0x1ec] sm:$0x80]   ;;  %v1406_v4 = vsel %vm25_vm5, %v3674_v49, %v1402_v63  ;;  %v3698_v25 = vld [vmem:[%s7751_s0 + $0x18e] sm:$0x10]   ;;  %v1498_v33 = vsel %vm13_vm2, %v3697_v24, %v1494_v28  ;;  %v3721_v63 = vld [vmem:[%s7751_s0 + $0x130] sm:$0x2]  }
  0x71   :  { %v3677_v51 = vld [vmem:[%s7751_s0 + $0x213] sm:$0x1]   ;;  %v1410_v10 = vsel %vm29_vm6, %v3675_v50, %v1406_v4  ;;  %v3699_v29 = vld [vmem:[%s7751_s0 + $0x1ad] sm:$0x20]   ;;  %v1502_v38 = vsel %vm17_vm3, %v3698_v25, %v1498_v33  ;;  %v3713_v50 = vld [vmem:[%s7751_s0 + $0x30] sm:$0x2]  }
  0x72   :  { %v3678_v54 = vld [vmem:[%s7751_s0 + $0x232] sm:$0x2]   ;;  %1411 = vrot.lane.b32.xlu1 %v1410_v10, %s4197_s4  ;;  %v3700_v30 = vld [vmem:[%s7751_s0 + $0x1cc] sm:$0x40]   ;;  %v1506_v43 = vsel %vm21_vm4, %v3699_v29, %v1502_v38  ;;  %v3723_v4 = vld [vmem:[%s7751_s0 + $0x16e] sm:$0x8]  }
  0x73   :  { %v3679_v55 = vld [vmem:[%s7751_s0 + $0x251] sm:$0x4]   ;;  %v1421_v59 = vsel %vm5_vm0, %v3678_v54, %v3677_v51  ;;  %v3701_v31 = vld [vmem:[%s7751_s0 + $0x1eb] sm:$0x80]   ;;  %v1510_v48 = vsel %vm25_vm5, %v3700_v30, %v1506_v43  ;;  %v3714_v51 = vld [vmem:[%s7751_s0 + $0x4f] sm:$0x4]  }
  0x74   :  { %v3680_v56 = vld [vmem:[%s7751_s0 + $0x270] sm:$0x8]   ;;  %v1425_v0 = vsel %vm9_vm1, %v3679_v55, %v1421_v59  ;;  %v3703_v34 = vld [vmem:[%s7751_s0 + $0x212] sm:$0x1]   ;;  %v1514_v53 = vsel %vm29_vm6, %v3701_v31, %v1510_v48  ;;  %v1560_v55 = vsel %vm5_vm0, %v3713_v50, %v3712_v47  ;;  %v3726_v10 = vld [vmem:[%s7751_s0 + $0x1cb] sm:$0x40]  }
  0x75   :  { %v3681_v60 = vld [vmem:[%s7751_s0 + $0x28f] sm:$0x10]   ;;  %v1429_v5 = vsel %vm13_vm2, %v3680_v56, %v1425_v0  ;;  %v3704_v35 = vld [vmem:[%s7751_s0 + $0x231] sm:$0x2]   ;;  %v3716_v56 = vld [vmem:[%s7751_s0 + $0x8d] sm:$0x10]  }
  0x76   :  { %v3682_v61 = vld [vmem:[%s7751_s0 + $0x2ae] sm:$0x20]   ;;  %v1433_v11 = vsel %vm17_vm3, %v3681_v60, %v1429_v5  ;;  %v3705_v36 = vld [vmem:[%s7751_s0 + $0x250] sm:$0x4]   ;;  %v1525_v39 = vsel %vm5_vm0, %v3704_v35, %v3703_v34  ;;  %1481 = vrot.lane.b32.xlu1 %v1480_v37, %s4198_s21  ;;  %v1564_v60 = vsel %vm9_vm1, %v3714_v51, %v1560_v55  ;;  %v3724_v5 = vld [vmem:[%s7751_s0 + $0x18d] sm:$0x10]  }
  0x77   :  { %v3683_v62 = vld [vmem:[%s7751_s0 + $0x2cd] sm:$0x40]   ;;  %v1437_v16 = vsel %vm21_vm4, %v3682_v61, %v1433_v11  ;;  %v3706_v40 = vld [vmem:[%s7751_s0 + $0x26f] sm:$0x8]   ;;  %v1529_v44 = vsel %vm9_vm1, %v3705_v36, %v1525_v39  ;;  %v3719_v61 = vld [vmem:[%s7751_s0 + $0xea] sm:$0x80]  }
  0x78   :  { %v3684_v1 = vld [vmem:[%s7751_s0 + $0x2ec] sm:$0x80]   ;;  %v1441_v20 = vsel %vm25_vm5, %v3683_v62, %v1437_v16  ;;  %v3707_v41 = vld [vmem:[%s7751_s0 + $0x28e] sm:$0x10]   ;;  %v1533_v49 = vsel %vm13_vm2, %v3706_v40, %v1529_v44  ;;  %v3720_v62 = vld [vmem:[%s7751_s0 + $0x111] sm:$0x1]  }
  0x79   :  { %v1445_v26 = vsel %vm29_vm6, %v3684_v1, %v1441_v20  ;;  %v3708_v42 = vld [vmem:[%s7751_s0 + $0x2ad] sm:$0x20]   ;;  %v1537_v54 = vsel %vm17_vm3, %v3707_v41, %v1533_v49  ;;  %v1568_v1 = vsel %vm13_vm2, %v3715_v52, %v1564_v60  ;;  %v1594_v2 = vsel %vm5_vm0, %v3721_v63, %v3720_v62  ;;  %v3727_v11 = vld [vmem:[%s7751_s0 + $0x1ea] sm:$0x80]   ;;  %v3738_v28 = vld [vmem:[%s7751_s0 + $0x10] sm:$0x1]  }
  0x7a   :  { %1446 = vrot.lane.b32.xlu0 %v1445_v26, %s4197_s4  ;;  %v3709_v45 = vld [vmem:[%s7751_s0 + $0x2cc] sm:$0x40]   ;;  %v1541_v59 = vsel %vm21_vm4, %v3708_v42, %v1537_v54  ;;  %v1572_v7 = vsel %vm17_vm3, %v3716_v56, %v1568_v1  ;;  %v1598_v8 = vsel %vm9_vm1, %v3722_v3, %v1594_v2  ;;  %v3729_v14 = vld [vmem:[%s7751_s0 + $0x211] sm:$0x1]   ;;  %v3739_v31 = vld [vmem:[%s7751_s0 + $0x2f] sm:$0x2]  }
  0x7b   :  { %v3710_v46 = vld [vmem:[%s7751_s0 + $0x2eb] sm:$0x80]   ;;  %v1545_v0 = vsel %vm25_vm5, %v3709_v45, %v1541_v59  ;;  %v1576_v12 = vsel %vm21_vm4, %v3717_v57, %v1572_v7  ;;  %v1602_v13 = vsel %vm13_vm2, %v3723_v4, %v1598_v8  ;;  %v3730_v15 = vld [vmem:[%s7751_s0 + $0x230] sm:$0x2]   ;;  %v3740_v32 = vld [vmem:[%s7751_s0 + $0x4e] sm:$0x4]   ;;  %v1664_v37 = vsel %vm5_vm0, %v3739_v31, %v3738_v28 }
  0x7c   :  { %v1549_v6 = vsel %vm29_vm6, %v3710_v46, %v1545_v0  ;;  %v3731_v16 = vld [vmem:[%s7751_s0 + $0x24f] sm:$0x4]   ;;  %v1580_v17 = vsel %vm25_vm5, %v3718_v58, %v1576_v12  ;;  %v1606_v18 = vsel %vm17_vm3, %v3724_v5, %v1602_v13  ;;  %v1629_v19 = vsel %vm5_vm0, %v3730_v15, %v3729_v14  ;;  %v3741_v33 = vld [vmem:[%s7751_s0 + $0x6d] sm:$0x8]   ;;  %v5665_v34 = vpop.permute.xlu0 %129   ;;  %v3764_v13 = vld [vmem:[%s7751_s0 + $0xf] sm:$0x1]  }
  0x7d   :  { %1550 = vrot.lane.b32.xlu1 %v1549_v6, %s4198_s21  ;;  %v3732_v20 = vld [vmem:[%s7751_s0 + $0x26e] sm:$0x8]   ;;  %v1584_v23 = vsel %vm29_vm6, %v3719_v61, %v1580_v17  ;;  %v1610_v24 = vsel %vm21_vm4, %v3725_v9, %v1606_v18  ;;  %v1633_v25 = vsel %vm9_vm1, %v3731_v16, %v1629_v19  ;;  %v3742_v38 = vld [vmem:[%s7751_s0 + $0x8c] sm:$0x10]   ;;  %v1668_v42 = vsel %vm9_vm1, %v3740_v32, %v1664_v37  ;;  %v3765_v14 = vld [vmem:[%s7751_s0 + $0x2e] sm:$0x2]  }
  0x7e   :  { %1515 = vrot.lane.b32.xlu0 %v1514_v53, %s4198_s21  ;;  %v3733_v21 = vld [vmem:[%s7751_s0 + $0x28d] sm:$0x10]   ;;  %v1614_v29 = vsel %vm25_vm5, %v3726_v10, %v1610_v24  ;;  %v1637_v30 = vsel %vm13_vm2, %v3732_v20, %v1633_v25  ;;  %v3743_v39 = vld [vmem:[%s7751_s0 + $0xab] sm:$0x20]   ;;  %v1672_v47 = vsel %vm13_vm2, %v3741_v33, %v1668_v42  ;;  %v3766_v15 = vld [vmem:[%s7751_s0 + $0x4d] sm:$0x4]   ;;  %v1768_v19 = vsel %vm5_vm0, %v3765_v14, %v3764_v13 }
  0x7f   :  { %v3734_v22 = vld [vmem:[%s7751_s0 + $0x2ac] sm:$0x20]   ;;  %v1618_v35 = vsel %vm29_vm6, %v3727_v11, %v1614_v29  ;;  %v1641_v36 = vsel %vm17_vm3, %v3733_v21, %v1637_v30  ;;  %v3744_v40 = vld [vmem:[%s7751_s0 + $0xca] sm:$0x40]   ;;  %v1676_v52 = vsel %vm17_vm3, %v3742_v38, %v1672_v47  ;;  %v3767_v20 = vld [vmem:[%s7751_s0 + $0x6c] sm:$0x8]   ;;  %v1772_v25 = vsel %vm9_vm1, %v3766_v15, %v1768_v19 }
  0x80   :  { %v3735_v26 = vld [vmem:[%s7751_s0 + $0x2cb] sm:$0x40]   ;;  %v1645_v41 = vsel %vm21_vm4, %v3734_v22, %v1641_v36  ;;  %v3745_v43 = vld [vmem:[%s7751_s0 + $0xe9] sm:$0x80]   ;;  %v1680_v57 = vsel %vm21_vm4, %v3743_v39, %v1676_v52  ;;  %v3768_v21 = vld [vmem:[%s7751_s0 + $0x8b] sm:$0x10]   ;;  %v1776_v31 = vsel %vm13_vm2, %v3767_v20, %v1772_v25 }
  0x81   :  { %v3736_v27 = vld [vmem:[%s7751_s0 + $0x2ea] sm:$0x80]   ;;  %1619 = vrot.lane.b32.xlu1 %v1618_v35, %s4199_s20  ;;  %v3746_v44 = vld [vmem:[%s7751_s0 + $0x110] sm:$0x1]   ;;  %v1649_v46 = vsel %vm25_vm5, %v3735_v26, %v1645_v41  ;;  %v1684_v63 = vsel %vm25_vm5, %v3744_v40, %v1680_v57  ;;  %v3769_v22 = vld [vmem:[%s7751_s0 + $0xaa] sm:$0x20]   ;;  %v1780_v37 = vsel %vm17_vm3, %v3768_v21, %v1776_v31 }
  0x82   :  { %1585 = vrot.lane.b32.xlu0 %v1584_v23, %s4199_s20  ;;  %v3747_v48 = vld [vmem:[%s7751_s0 + $0x12f] sm:$0x2]   ;;  %v1653_v51 = vsel %vm29_vm6, %v3736_v27, %v1649_v46  ;;  %v1688_v5 = vsel %vm29_vm6, %v3745_v43, %v1684_v63  ;;  %v3770_v26 = vld [vmem:[%s7751_s0 + $0xc9] sm:$0x40]   ;;  %v1784_v42 = vsel %vm21_vm4, %v3769_v22, %v1780_v37  ;;  %v3796_v13 = vld [vmem:[%s7751_s0 + $0xc8] sm:$0x40]  }
  0x83   :  { %v3748_v49 = vld [vmem:[%s7751_s0 + $0x14e] sm:$0x4]   ;;  %v1698_v53 = vsel %vm5_vm0, %v3747_v48, %v3746_v44  ;;  %v3771_v27 = vld [vmem:[%s7751_s0 + $0xe8] sm:$0x80]   ;;  %v3797_v14 = vld [vmem:[%s7751_s0 + $0xe7] sm:$0x80]  }
  0x84   :  { %v5688_v45 = vpop.permute.xlu1 %198   ;;  %v3749_v50 = vld [vmem:[%s7751_s0 + $0x16d] sm:$0x8]   ;;  %v1702_v58 = vsel %vm9_vm1, %v3748_v49, %v1698_v53  ;;  %v3772_v28 = vld [vmem:[%s7751_s0 + $0x10f] sm:$0x1]   ;;  %v1788_v49 = vsel %vm25_vm5, %v3770_v26, %v1784_v42  ;;  %v3798_v19 = vld [vmem:[%s7751_s0 + $0x10e] sm:$0x1]  }
  0x85   :  { %v3750_v54 = vld [vmem:[%s7751_s0 + $0x18c] sm:$0x10]   ;;  %v1706_v0 = vsel %vm13_vm2, %v3749_v50, %v1702_v58  ;;  %1689 = vrot.lane.b32.xlu1 %v1688_v5, %s4200_s8  ;;  %v3773_v32 = vld [vmem:[%s7751_s0 + $0x12e] sm:$0x2]   ;;  %v3799_v20 = vld [vmem:[%s7751_s0 + $0x12d] sm:$0x2]  }
  0x86   :  { %v3751_v55 = vld [vmem:[%s7751_s0 + $0x1ab] sm:$0x20]   ;;  %1654 = vrot.lane.b32.xlu0 %v1653_v51, %s4199_s20  ;;  %v1710_v6 = vsel %vm17_vm3, %v3750_v54, %v1706_v0  ;;  %v3774_v33 = vld [vmem:[%s7751_s0 + $0x14d] sm:$0x4]   ;;  %v1802_v38 = vsel %vm5_vm0, %v3773_v32, %v3772_v28  ;;  %v3790_v0 = vld [vmem:[%s7751_s0 + $0xe] sm:$0x1]  }
  0x87   :  { %v3752_v56 = vld [vmem:[%s7751_s0 + $0x1ca] sm:$0x40]   ;;  %v1714_v11 = vsel %vm21_vm4, %v3751_v55, %v1710_v6  ;;  %v3775_v35 = vld [vmem:[%s7751_s0 + $0x16c] sm:$0x8]   ;;  %v1806_v43 = vsel %vm9_vm1, %v3774_v33, %v1802_v38  ;;  %v1792_v55 = vsel %vm29_vm6, %v3771_v27, %v1788_v49  ;;  %v3800_v21 = vld [vmem:[%s7751_s0 + $0x14c] sm:$0x4]  }
  0x88   :  { %v3753_v59 = vld [vmem:[%s7751_s0 + $0x1e9] sm:$0x80]   ;;  %v5763_v16 = vpop.permute.xlu1 %233   ;;  %v1718_v17 = vsel %vm25_vm5, %v3752_v56, %v1714_v11  ;;  %v3776_v39 = vld [vmem:[%s7751_s0 + $0x18b] sm:$0x10]   ;;  %v1810_v50 = vsel %vm13_vm2, %v3775_v35, %v1806_v43  ;;  %v3801_v25 = vld [vmem:[%s7751_s0 + $0x16b] sm:$0x8]  }
  0x89   :  { %v3755_v60 = vld [vmem:[%s7751_s0 + $0x210] sm:$0x1]   ;;  %v1722_v23 = vsel %vm29_vm6, %v3753_v59, %v1718_v17  ;;  %v3777_v40 = vld [vmem:[%s7751_s0 + $0x1aa] sm:$0x20]   ;;  %v1814_v56 = vsel %vm17_vm3, %v3776_v39, %v1810_v50  ;;  %v3802_v26 = vld [vmem:[%s7751_s0 + $0x18a] sm:$0x10]  }
  0x8a   :  { %v3756_v61 = vld [vmem:[%s7751_s0 + $0x22f] sm:$0x2]   ;;  %1723 = vrot.lane.b32.xlu0 %v1722_v23, %s4200_s8  ;;  %v3778_v41 = vld [vmem:[%s7751_s0 + $0x1c9] sm:$0x40]   ;;  %v3803_v27 = vld [vmem:[%s7751_s0 + $0x1a9] sm:$0x20]  }
  0x8b   :  { %v1733_v1 = vsel %vm5_vm0, %v3756_v61, %v3755_v60  ;;  %v3757_v2 = vld [vmem:[%s7751_s0 + $0x24e] sm:$0x4]   ;;  %v3779_v44 = vld [vmem:[%s7751_s0 + $0x1e8] sm:$0x80]   ;;  %v1818_v61 = vsel %vm21_vm4, %v3777_v40, %v1814_v56  ;;  %v3804_v31 = vld [vmem:[%s7751_s0 + $0x1c8] sm:$0x40]  }
  0x8c   :  { %v5725_v62 = vpop.permute.xlu0 %163   ;;  %v3758_v3 = vld [vmem:[%s7751_s0 + $0x26d] sm:$0x8]   ;;  %v1737_v7 = vsel %vm9_vm1, %v3757_v2, %v1733_v1  ;;  %v3781_v46 = vld [vmem:[%s7751_s0 + $0x20f] sm:$0x1]   ;;  %v3791_v1 = vld [vmem:[%s7751_s0 + $0x2d] sm:$0x2]  }
  0x8d   :  { %v3759_v4 = vld [vmem:[%s7751_s0 + $0x28c] sm:$0x10]   ;;  %v1741_v12 = vsel %vm13_vm2, %v3758_v3, %v1737_v7  ;;  %v3782_v47 = vld [vmem:[%s7751_s0 + $0x22e] sm:$0x2]   ;;  %v5827_v48 = vpop.permute.xlu1 %302   ;;  %v3792_v2 = vld [vmem:[%s7751_s0 + $0x4c] sm:$0x4]   ;;  %v1872_v6 = vsel %vm5_vm0, %v3791_v1, %v3790_v0 }
  0x8e   :  { %v3760_v8 = vld [vmem:[%s7751_s0 + $0x2ab] sm:$0x20]   ;;  %v1745_v18 = vsel %vm17_vm3, %v3759_v4, %v1741_v12  ;;  %v1837_v51 = vsel %vm5_vm0, %v3782_v47, %v3781_v46  ;;  %v3783_v52 = vld [vmem:[%s7751_s0 + $0x24d] sm:$0x4]   ;;  %1793 = vrot.lane.b32.xlu0 %v1792_v55, %s4201_s27  ;;  %v1822_v4 = vsel %vm25_vm5, %v3778_v41, %v1818_v61  ;;  %v3793_v7 = vld [vmem:[%s7751_s0 + $0x6b] sm:$0x8]   ;;  %v1876_v12 = vsel %vm9_vm1, %v3792_v2, %v1872_v6 }
  0x8f   :  { %v3761_v9 = vld [vmem:[%s7751_s0 + $0x2ca] sm:$0x40]   ;;  %v1749_v24 = vsel %vm21_vm4, %v3760_v8, %v1745_v18  ;;  %v3784_v53 = vld [vmem:[%s7751_s0 + $0x26c] sm:$0x8]   ;;  %v1841_v57 = vsel %vm9_vm1, %v3783_v52, %v1837_v51  ;;  %v3794_v8 = vld [vmem:[%s7751_s0 + $0x8a] sm:$0x10]   ;;  %v1880_v18 = vsel %vm13_vm2, %v3793_v7, %v1876_v12 }
  0x90   :  { %v3762_v10 = vld [vmem:[%s7751_s0 + $0x2e9] sm:$0x80]   ;;  %v5789_v29 = vpop.permute.xlu0 %267   ;;  %v1753_v30 = vsel %vm25_vm5, %v3761_v9, %v1749_v24  ;;  %v3785_v54 = vld [vmem:[%s7751_s0 + $0x28b] sm:$0x10]   ;;  %v1845_v63 = vsel %vm13_vm2, %v3784_v53, %v1841_v57  ;;  %v3795_v9 = vld [vmem:[%s7751_s0 + $0xa9] sm:$0x20]   ;;  %v1884_v23 = vsel %vm17_vm3, %v3794_v8, %v1880_v18  ;;  %v1906_v24 = vsel %vm5_vm0, %v3799_v20, %v3798_v19 }
  0x91   :  { %v1757_v36 = vsel %vm29_vm6, %v3762_v10, %v1753_v30  ;;  %v3786_v58 = vld [vmem:[%s7751_s0 + $0x2aa] sm:$0x20]   ;;  %v1849_v5 = vsel %vm17_vm3, %v3785_v54, %v1845_v63  ;;  %v1826_v10 = vsel %vm29_vm6, %v3779_v44, %v1822_v4  ;;  %v5888_v15 = vpop.permute.xlu1 %371   ;;  %v1888_v28 = vsel %vm21_vm4, %v3795_v9, %v1884_v23  ;;  %v3805_v32 = vld [vmem:[%s7751_s0 + $0x1e7] sm:$0x80]   ;;  %v3816_v52 = vld [vmem:[%s7751_s0 + $0xd] sm:$0x1]  }
  0x92   :  { %1758 = vrot.lane.b32.xlu1 %v1757_v36, %s4200_s8  ;;  %v3787_v59 = vld [vmem:[%s7751_s0 + $0x2c9] sm:$0x40]   ;;  %v1853_v11 = vsel %vm21_vm4, %v3786_v58, %v1849_v5  ;;  %v1910_v30 = vsel %vm9_vm1, %v3800_v21, %v1906_v24  ;;  %v3807_v33 = vld [vmem:[%s7751_s0 + $0x20e] sm:$0x1]   ;;  %v1892_v36 = vsel %vm25_vm5, %v3796_v13, %v1888_v28  ;;  %v3817_v53 = vld [vmem:[%s7751_s0 + $0x2c] sm:$0x2]  }
  0x93   :  { %v3788_v60 = vld [vmem:[%s7751_s0 + $0x2e8] sm:$0x80]   ;;  %v1857_v17 = vsel %vm25_vm5, %v3787_v59, %v1853_v11  ;;  %v1914_v37 = vsel %vm13_vm2, %v3801_v25, %v1910_v30  ;;  %v3808_v38 = vld [vmem:[%s7751_s0 + $0x22d] sm:$0x2]   ;;  %v1896_v41 = vsel %vm29_vm6, %v3797_v14, %v1892_v36  ;;  %v1976_v57 = vsel %vm5_vm0, %v3817_v53, %v3816_v52  ;;  %v3818_v58 = vld [vmem:[%s7751_s0 + $0x4b] sm:$0x4]  }
  0x94   :  { %v5865_v3 = vpop.permute.xlu0 %337   ;;  %v1861_v22 = vsel %vm29_vm6, %v3788_v60, %v1857_v17  ;;  %v3809_v39 = vld [vmem:[%s7751_s0 + $0x24c] sm:$0x4]   ;;  %v1918_v42 = vsel %vm17_vm3, %v3802_v26, %v1914_v37  ;;  %v1941_v43 = vsel %vm5_vm0, %v3808_v38, %v3807_v33  ;;  %v3819_v59 = vld [vmem:[%s7751_s0 + $0x6a] sm:$0x8]   ;;  %v1980_v0 = vsel %vm9_vm1, %v3818_v58, %v1976_v57  ;;  %v3327_v57 = vld [vmem:[%s7751_s0 + $0x9b] sm:$0x20]  }
  0x95   :  { %1862 = vrot.lane.b32.xlu0 %v1861_v22, %s4201_s27  ;;  %v3810_v40 = vld [vmem:[%s7751_s0 + $0x26b] sm:$0x8]   ;;  %v1922_v49 = vsel %vm21_vm4, %v3803_v27, %v1918_v42  ;;  %v1945_v50 = vsel %vm9_vm1, %v3809_v39, %v1941_v43  ;;  %v5963_v54 = vpop.permute.xlu1 %441   ;;  %v3820_v60 = vld [vmem:[%s7751_s0 + $0x89] sm:$0x10]   ;;  %v1984_v6 = vsel %vm13_vm2, %v3819_v59, %v1980_v0  ;;  %v2_v43 = vld [vmem:[%s7751_s0] sm:$0x1]  }
  0x96   :  { %1827 = vrot.lane.b32.xlu1 %v1826_v10, %s4201_s27  ;;  %v3811_v44 = vld [vmem:[%s7751_s0 + $0x28a] sm:$0x10]   ;;  %v1926_v55 = vsel %vm25_vm5, %v3804_v31, %v1922_v49  ;;  %v1949_v56 = vsel %vm13_vm2, %v3810_v40, %v1945_v50  ;;  %v3821_v1 = vld [vmem:[%s7751_s0 + $0xa8] sm:$0x20]   ;;  %v1988_v12 = vsel %vm17_vm3, %v3820_v60, %v1984_v6  ;;  %v3323_v49 = vld [vmem:[%s7751_s0 + $0x1f] sm:$0x2]  }
  0x97   :  { %v3812_v46 = vld [vmem:[%s7751_s0 + $0x2a9] sm:$0x20]   ;;  %v1930_v61 = vsel %vm29_vm6, %v3805_v32, %v1926_v55  ;;  %v1953_v63 = vsel %vm17_vm3, %v3811_v44, %v1949_v56  ;;  %v3822_v2 = vld [vmem:[%s7751_s0 + $0xc7] sm:$0x40]   ;;  %v1992_v20 = vsel %vm21_vm4, %v3821_v1, %v1988_v12  ;;  %v3324_v50 = vld [vmem:[%s7751_s0 + $0x3e] sm:$0x4]   ;;  %v6_v55 = vsel %vm5_vm0, %v3323_v49, %v2_v43 }
  0x98   :  { %v5926_v35 = vpop.permute.xlu0 %406   ;;  %v3813_v47 = vld [vmem:[%s7751_s0 + $0x2c8] sm:$0x40]   ;;  %v3823_v4 = vld [vmem:[%s7751_s0 + $0xe6] sm:$0x80]   ;;  %v1957_v5 = vsel %vm21_vm4, %v3812_v46, %v1953_v63  ;;  %v1996_v26 = vsel %vm25_vm5, %v3822_v2, %v1992_v20  ;;  %v3326_v56 = vld [vmem:[%s7751_s0 + $0x7c] sm:$0x10]   ;;  %v10_v60 = vsel %vm9_vm1, %v3324_v50, %v6_v55 }
  0x99   :  { %v3814_v51 = vld [vmem:[%s7751_s0 + $0x2e7] sm:$0x80]   ;;  %1931 = vrot.lane.b32.xlu0 %v1930_v61, %s4202_s17  ;;  %v3824_v7 = vld [vmem:[%s7751_s0 + $0x10d] sm:$0x1]   ;;  %v1961_v11 = vsel %vm25_vm5, %v3813_v47, %v1957_v5  ;;  %v2000_v32 = vsel %vm29_vm6, %v3823_v4, %v1996_v26  ;;  %v3328_v58 = vld [vmem:[%s7751_s0 + $0xba] sm:$0x40]  }
  0x9a   :  { %1897 = vrot.lane.b32.xlu1 %v1896_v41, %s4202_s17  ;;  %v3825_v8 = vld [vmem:[%s7751_s0 + $0x12c] sm:$0x2]   ;;  %v1965_v19 = vsel %vm29_vm6, %v3814_v51, %v1961_v11  ;;  %v3325_v51 = vld [vmem:[%s7751_s0 + $0x5d] sm:$0x8]   ;;  %v3842_v63 = vld [vmem:[%s7751_s0 + $0xc] sm:$0x1]  }
  0x9b   :  { %v3826_v9 = vld [vmem:[%s7751_s0 + $0x14b] sm:$0x4]   ;;  %v2010_v13 = vsel %vm5_vm0, %v3825_v8, %v3824_v7  ;;  %v3329_v61 = vld [vmem:[%s7751_s0 + $0xd9] sm:$0x80]   ;;  %v3843_v0 = vld [vmem:[%s7751_s0 + $0x2b] sm:$0x2]   ;;  %v14_v4 = vsel %vm13_vm2, %v3325_v51, %v10_v60 }
  0x9c   :  { %v6001_v10 = vpop.permute.xlu0 %475   ;;  %v3827_v14 = vld [vmem:[%s7751_s0 + $0x16a] sm:$0x8]   ;;  %v2014_v21 = vsel %vm9_vm1, %v3826_v9, %v2010_v13  ;;  %v2080_v5 = vsel %vm5_vm0, %v3843_v0, %v3842_v63  ;;  %v3844_v6 = vld [vmem:[%s7751_s0 + $0x4a] sm:$0x4]   ;;  %v18_v11 = vsel %vm17_vm3, %v3326_v56, %v14_v4  ;;  %v3340_v43 = vld [vmem:[%s7751_s0 + $0x21f] sm:$0x2]  }
  0x9d   :  { %v3828_v17 = vld [vmem:[%s7751_s0 + $0x189] sm:$0x10]   ;;  %v2018_v27 = vsel %vm13_vm2, %v3827_v14, %v2014_v21  ;;  %2001 = vrot.lane.b32.xlu0 %v2000_v32, %s4203_s9  ;;  %v3845_v7 = vld [vmem:[%s7751_s0 + $0x69] sm:$0x8]   ;;  %v2084_v12 = vsel %vm9_vm1, %v3844_v6, %v2080_v5  ;;  %v3342_v50 = vld [vmem:[%s7751_s0 + $0x25d] sm:$0x8]  }
  0x9e   :  { %v3829_v18 = vld [vmem:[%s7751_s0 + $0x1a8] sm:$0x20]   ;;  %1966 = vrot.lane.b32.xlu1 %v1965_v19, %s4202_s17  ;;  %v2022_v33 = vsel %vm17_vm3, %v3828_v17, %v2018_v27  ;;  %v3846_v8 = vld [vmem:[%s7751_s0 + $0x88] sm:$0x10]   ;;  %v22_v19 = vsel %vm21_vm4, %v3327_v57, %v18_v11  ;;  %v2088_v20 = vsel %vm13_vm2, %v3845_v7, %v2084_v12  ;;  %v3343_v51 = vld [vmem:[%s7751_s0 + $0x27c] sm:$0x10]  }
  0x9f   :  { %v3830_v22 = vld [vmem:[%s7751_s0 + $0x1c7] sm:$0x40]   ;;  %v2026_v40 = vsel %vm21_vm4, %v3829_v18, %v2022_v33  ;;  %v3847_v13 = vld [vmem:[%s7751_s0 + $0xa7] sm:$0x20]   ;;  %v3345_v56 = vld [vmem:[%s7751_s0 + $0x2ba] sm:$0x40]  }
  0xa0   :  { %v3831_v23 = vld [vmem:[%s7751_s0 + $0x1e6] sm:$0x80]   ;;  %v6062_v44 = vpop.permute.xlu0 %545   ;;  %v2030_v46 = vsel %vm25_vm5, %v3830_v22, %v2026_v40  ;;  %v3848_v14 = vld [vmem:[%s7751_s0 + $0xc6] sm:$0x40]   ;;  %v3346_v57 = vld [vmem:[%s7751_s0 + $0x2d9] sm:$0x80]  }
  0xa1   :  { %v3833_v24 = vld [vmem:[%s7751_s0 + $0x20d] sm:$0x1]   ;;  %v2034_v52 = vsel %vm29_vm6, %v3831_v23, %v2030_v46  ;;  %v3849_v17 = vld [vmem:[%s7751_s0 + $0xe5] sm:$0x80]   ;;  %v26_v23 = vsel %vm25_vm5, %v3328_v58, %v22_v19  ;;  %v3341_v46 = vld [vmem:[%s7751_s0 + $0x23e] sm:$0x4]  }
  0xa2   :  { %v3834_v28 = vld [vmem:[%s7751_s0 + $0x22c] sm:$0x2]   ;;  %2035 = vrot.lane.b32.xlu1 %v2034_v52, %s4203_s9  ;;  %v3850_v21 = vld [vmem:[%s7751_s0 + $0x10c] sm:$0x1]   ;;  %v3344_v52 = vld [vmem:[%s7751_s0 + $0x29b] sm:$0x20]  }
  0xa3   :  { %v3835_v30 = vld [vmem:[%s7751_s0 + $0x24b] sm:$0x4]   ;;  %v2045_v36 = vsel %vm5_vm0, %v3834_v28, %v3833_v24  ;;  %v3851_v22 = vld [vmem:[%s7751_s0 + $0x12b] sm:$0x2]   ;;  %v2092_v24 = vsel %vm17_vm3, %v3846_v8, %v2088_v20  ;;  %v3330_v58 = vld [vmem:[%s7751_s0 + $0x100] sm:$0x1]  }
  0xa4   :  { %v6027_v25 = vpop.permute.xlu1 %510   ;;  %v3836_v31 = vld [vmem:[%s7751_s0 + $0x26a] sm:$0x8]   ;;  %v2049_v41 = vsel %vm9_vm1, %v3835_v30, %v2045_v36  ;;  %v2114_v26 = vsel %vm5_vm0, %v3851_v22, %v3850_v21  ;;  %v3852_v27 = vld [vmem:[%s7751_s0 + $0x14a] sm:$0x4]   ;;  %v2096_v32 = vsel %vm21_vm4, %v3847_v13, %v2092_v24  ;;  %v3331_v63 = vld [vmem:[%s7751_s0 + $0x11f] sm:$0x2]  }
  0xa5   :  { %v3837_v37 = vld [vmem:[%s7751_s0 + $0x289] sm:$0x10]   ;;  %v2053_v47 = vsel %vm13_vm2, %v3836_v31, %v2049_v41  ;;  %v3853_v28 = vld [vmem:[%s7751_s0 + $0x169] sm:$0x8]   ;;  %v30_v31 = vsel %vm29_vm6, %v3329_v61, %v26_v23  ;;  %v2118_v33 = vsel %vm9_vm1, %v3852_v27, %v2114_v26  ;;  %v2100_v40 = vsel %vm25_vm5, %v3848_v14, %v2096_v32  ;;  %v3332_v0 = vld [vmem:[%s7751_s0 + $0x13e] sm:$0x4]  }
  0xa6   :  { %v3838_v38 = vld [vmem:[%s7751_s0 + $0x2a8] sm:$0x20]   ;;  %v2057_v53 = vsel %vm17_vm3, %v3837_v37, %v2053_v47  ;;  %v6125_v18 = vpop.permute.xlu0 %614   ;;  %v3854_v30 = vld [vmem:[%s7751_s0 + $0x188] sm:$0x10]   ;;  %32 = vst.msk [vmem:[%s7752_s1] sm:$0xff] %vm31_vm7, %v30_v31   ;;  %v2122_v41 = vsel %vm13_vm2, %v3853_v28, %v2118_v33  ;;  %v38_v6 = vsel %vm5_vm0, %v3331_v63, %v3330_v58  ;;  %vm235_vm9 = vcmask 1015744  }
  0xa7   :  { %v3839_v39 = vld [vmem:[%s7751_s0 + $0x2c7] sm:$0x40]   ;;  %v2061_v59 = vsel %vm21_vm4, %v3838_v38, %v2057_v53  ;;  %v3855_v36 = vld [vmem:[%s7751_s0 + $0x1a7] sm:$0x20]   ;;  %132 = vst.msk [vmem:[%s7752_s1] sm:$0xff] %vm131_vm8, %v5665_v34   ;;  %v2104_v34 = vsel %vm29_vm6, %v3849_v17, %v2100_v40  ;;  %v2126_v47 = vsel %vm17_vm3, %v3854_v30, %v2122_v41  ;;  %v42_v12 = vsel %vm9_vm1, %v3332_v0, %v38_v6  ;;  %s4206_s30 = smov 40  }
  0xa8   :  { %v3840_v42 = vld [vmem:[%s7751_s0 + $0x2e6] sm:$0x80]   ;;  %v6099_v1 = vpop.permute.xlu1 %579   ;;  %v2065_v2 = vsel %vm25_vm5, %v3839_v39, %v2061_v59  ;;  %v3856_v37 = vld [vmem:[%s7751_s0 + $0x1c6] sm:$0x40]   ;;  %2105 = vrot.lane.b32.xlu1 %v2104_v34, %s4204_s19  ;;  %v2130_v53 = vsel %vm21_vm4, %v3855_v36, %v2126_v47  ;;  %v3334_v7 = vld [vmem:[%s7751_s0 + $0x17c] sm:$0x10]  }
  0xa9   :  { %v2069_v9 = vsel %vm29_vm6, %v3840_v42, %v2065_v2  ;;  %v3857_v38 = vld [vmem:[%s7751_s0 + $0x1e5] sm:$0x80]   ;;  %v3339_v42 = vld [vmem:[%s7751_s0 + $0x200] sm:$0x1]   ;;  %v2134_v60 = vsel %vm25_vm5, %v3856_v37, %v2130_v53  ;;  %v3868_v40 = vld [vmem:[%s7751_s0 + $0xb] sm:$0x1]  }
  0xaa   :  { %2070 = vrot.lane.b32.xlu0 %v2069_v9, %s4203_s9  ;;  %v71_v49 = vsel %vm5_vm0, %v3340_v43, %v3339_v42  ;;  %v3333_v2 = vld [vmem:[%s7751_s0 + $0x15d] sm:$0x8]   ;;  %v2138_v4 = vsel %vm29_vm6, %v3857_v38, %v2134_v60  ;;  %v3859_v14 = vld [vmem:[%s7751_s0 + $0x20c] sm:$0x1]   ;;  %v3869_v41 = vld [vmem:[%s7751_s0 + $0x2a] sm:$0x2]  }
  0xab   :  { %v75_v55 = vsel %vm9_vm1, %v3341_v46, %v71_v49  ;;  %v6206_v59 = vpop.permute.xlu0 %683   ;;  %v3335_v8 = vld [vmem:[%s7751_s0 + $0x19b] sm:$0x20]   ;;  %v3860_v17 = vld [vmem:[%s7751_s0 + $0x22b] sm:$0x2]   ;;  %v46_v21 = vsel %vm13_vm2, %v3333_v2, %v42_v12  ;;  %v3870_v42 = vld [vmem:[%s7751_s0 + $0x49] sm:$0x4]   ;;  %v2184_v46 = vsel %vm5_vm0, %v3869_v41, %v3868_v40 }
  0xac   :  { %v6160_v39 = vpop.permute.xlu1 %649   ;;  %v79_v61 = vsel %vm13_vm2, %v3342_v50, %v75_v55  ;;  %v3336_v9 = vld [vmem:[%s7751_s0 + $0x1ba] sm:$0x40]   ;;  %v2149_v22 = vsel %vm5_vm0, %v3860_v17, %v3859_v14  ;;  %v3861_v23 = vld [vmem:[%s7751_s0 + $0x24a] sm:$0x4]   ;;  %v50_v28 = vsel %vm17_vm3, %v3334_v7, %v46_v21  ;;  %v3871_v34 = vld [vmem:[%s7751_s0 + $0x68] sm:$0x8]  }
  0xad   :  { %v83_v5 = vsel %vm17_vm3, %v3343_v51, %v79_v61  ;;  %v3337_v13 = vld [vmem:[%s7751_s0 + $0x1d9] sm:$0x80]   ;;  %v3862_v24 = vld [vmem:[%s7751_s0 + $0x269] sm:$0x8]   ;;  %v2153_v30 = vsel %vm9_vm1, %v3861_v23, %v2149_v22  ;;  %v54_v37 = vsel %vm21_vm4, %v3335_v8, %v50_v28  ;;  %v3872_v47 = vld [vmem:[%s7751_s0 + $0x87] sm:$0x10]  }
  0xae   :  { %2139 = vrot.lane.b32.xlu0 %v2138_v4, %s4204_s19  ;;  %v87_v11 = vsel %vm21_vm4, %v3344_v52, %v83_v5  ;;  %v3863_v26 = vld [vmem:[%s7751_s0 + $0x288] sm:$0x10]   ;;  %v2157_v38 = vsel %vm13_vm2, %v3862_v24, %v2153_v30  ;;  %v3873_v49 = vld [vmem:[%s7751_s0 + $0xa6] sm:$0x20]   ;;  %v2188_v52 = vsel %vm9_vm1, %v3870_v42, %v2184_v46  ;;  %236 = vst.msk [vmem:[%s7752_s1] sm:$0xff] %vm235_vm9, %v5763_v16   ;;  %vm339_vm10 = vcmask 982944  }
  0xaf   :  { %v91_v20 = vsel %vm25_vm5, %v3345_v56, %v87_v11  ;;  %v3864_v31 = vld [vmem:[%s7751_s0 + $0x2a7] sm:$0x20]   ;;  %v6269_v36 = vpop.permute.xlu0 %753   ;;  %v2161_v43 = vsel %vm17_vm3, %v3863_v26, %v2157_v38  ;;  %v3874_v53 = vld [vmem:[%s7751_s0 + $0xc5] sm:$0x40]   ;;  %v2192_v58 = vsel %vm13_vm2, %v3871_v34, %v2188_v52  ;;  %340 = vst.msk [vmem:[%s7752_s1] sm:$0xff] %vm339_vm10, %v5865_v3   ;;  %vm443_vm11 = vcmask 950144  }
  0xb0   :  { %v6243_v19 = vpop.permute.xlu1 %718   ;;  %v95_v27 = vsel %vm29_vm6, %v3346_v57, %v91_v20  ;;  %v3865_v32 = vld [vmem:[%s7751_s0 + $0x2c6] sm:$0x40]   ;;  %v2165_v51 = vsel %vm21_vm4, %v3864_v31, %v2161_v43  ;;  %v3875_v55 = vld [vmem:[%s7751_s0 + $0xe4] sm:$0x80]   ;;  %v3895_v3 = vld [vmem:[%s7751_s0 + $0x29] sm:$0x2]  }
  0xb1   :  { %v3866_v33 = vld [vmem:[%s7751_s0 + $0x2e5] sm:$0x80]   ;;  %3347 = vst.msk [vmem:[%s7752_s1 + $0x10] sm:$0xff] %vm31_vm7, %v95_v27   ;;  %v2169_v57 = vsel %vm25_vm5, %v3865_v32, %v2165_v51  ;;  %v3876_v16 = vld [vmem:[%s7751_s0 + $0x10b] sm:$0x1]   ;;  %vm547_vm12 = vcmask 917344  }
  0xb2   :  { %3373 = vst.msk [vmem:[%s7752_s1 + $0x10] sm:$0xff] %vm131_vm8, %v5688_v45   ;;  %v58_v45 = vsel %vm25_vm5, %v3336_v9, %v54_v37  ;;  %v3877_v60 = vld [vmem:[%s7751_s0 + $0x12a] sm:$0x2]   ;;  %v3894_v32 = vld [vmem:[%s7751_s0 + $0xa] sm:$0x1]   ;;  %s4207_s29 = smov 36  }
  0xb3   :  { %v62_v50 = vsel %vm29_vm6, %v3337_v13, %v58_v45  ;;  %v3878_v61 = vld [vmem:[%s7751_s0 + $0x149] sm:$0x4]   ;;  %3399 = vst.msk [vmem:[%s7752_s1 + $0x10] sm:$0xff] %vm235_vm9, %v5827_v48   ;;  %v2196_v48 = vsel %vm17_vm3, %v3872_v47, %v2192_v58  ;;  %v2218_v63 = vsel %vm5_vm0, %v3877_v60, %v3876_v16  ;;  %v3896_v38 = vld [vmem:[%s7751_s0 + $0x48] sm:$0x4]   ;;  %v2288_v41 = vsel %vm5_vm0, %v3895_v3, %v3894_v32  ;;  %s4208_s12 = smov 32  }
  0xb4   :  { %v6312_v56 = vpop.permute.xlu1 %787   ;;  %3338 = vst.msk [vmem:[%s7752_s1 + $0x8] sm:$0xff] %vm31_vm7, %v62_v50   ;;  %v3879_v0 = vld [vmem:[%s7751_s0 + $0x168] sm:$0x8]   ;;  %v2200_v5 = vsel %vm21_vm4, %v3873_v49, %v2196_v48  ;;  %v3897_v40 = vld [vmem:[%s7751_s0 + $0x67] sm:$0x8]   ;;  %v2292_v47 = vsel %vm9_vm1, %v3896_v38, %v2288_v41  ;;  %vm651_vm13 = vcmask 884544  }
  0xb5   :  { %3364 = vst.msk [vmem:[%s7752_s1 + $0x8] sm:$0xff] %vm131_vm8, %v5725_v62   ;;  %v2173_v62 = vsel %vm29_vm6, %v3866_v33, %v2169_v57  ;;  %v3880_v2 = vld [vmem:[%s7751_s0 + $0x187] sm:$0x10]   ;;  %v2204_v11 = vsel %vm25_vm5, %v3874_v53, %v2200_v5  ;;  %v3898_v42 = vld [vmem:[%s7751_s0 + $0x86] sm:$0x10]   ;;  %v2296_v53 = vsel %vm13_vm2, %v3897_v40, %v2292_v47  ;;  %vm755_vm14 = vcmask 851744  }
  0xb6   :  { %v3881_v4 = vld [vmem:[%s7751_s0 + $0x1a6] sm:$0x20]   ;;  %2174 = vrot.lane.b32.xlu1 %v2173_v62, %s4204_s19  ;;  %3390 = vst.msk [vmem:[%s7752_s1 + $0x8] sm:$0xff] %vm235_vm9, %v5789_v29   ;;  %v2222_v29 = vsel %vm9_vm1, %v3878_v61, %v2218_v63  ;;  %v2208_v20 = vsel %vm29_vm6, %v3875_v55, %v2204_v11  ;;  %v3899_v45 = vld [vmem:[%s7751_s0 + $0xa5] sm:$0x20]   ;;  %v2300_v61 = vsel %vm17_vm3, %v3898_v42, %v2296_v53  ;;  %s4209_s23 = smov 28  }
  0xb7   :  { %v3882_v6 = vld [vmem:[%s7751_s0 + $0x1c5] sm:$0x40]   ;;  %v2226_v12 = vsel %vm13_vm2, %v3879_v0, %v2222_v29  ;;  %2209 = vrot.lane.b32.xlu0 %v2208_v20, %s4205_s28  ;;  %3416 = vst.msk [vmem:[%s7752_s1 + $0x8] sm:$0xff] %vm339_vm10, %v5888_v15   ;;  %3425 = vst.msk [vmem:[%s7752_s1 + $0x10] sm:$0xff] %vm339_vm10, %v5926_v35   ;;  %s4210_s15 = smov 24   ;;  %vm859_vm15 = vcmask 818944  }
  0xb8   :  { %v3883_v7 = vld [vmem:[%s7751_s0 + $0x1e4] sm:$0x80]   ;;  %v2230_v21 = vsel %vm17_vm3, %v3880_v2, %v2226_v12  ;;  %v6398_v27 = vpop.permute.xlu1 %857   ;;  %v3900_v43 = vld [vmem:[%s7751_s0 + $0xc4] sm:$0x40]   ;;  %v3921_v32 = vld [vmem:[%s7751_s0 + $0x28] sm:$0x2]  }
  0xb9   :  { %v3885_v8 = vld [vmem:[%s7751_s0 + $0x20b] sm:$0x1]   ;;  %v2234_v28 = vsel %vm21_vm4, %v3881_v4, %v2230_v21  ;;  %v3901_v49 = vld [vmem:[%s7751_s0 + $0xe3] sm:$0x80]   ;;  %v2304_v4 = vsel %vm21_vm4, %v3899_v45, %v2300_v61  ;;  %v3926_v41 = vld [vmem:[%s7751_s0 + $0xc3] sm:$0x40]  }
  0xba   :  { %v3886_v13 = vld [vmem:[%s7751_s0 + $0x22a] sm:$0x2]   ;;  %v2238_v33 = vsel %vm25_vm5, %v3882_v6, %v2234_v28  ;;  %v3902_v50 = vld [vmem:[%s7751_s0 + $0x10a] sm:$0x1]   ;;  %v3928_v47 = vld [vmem:[%s7751_s0 + $0x109] sm:$0x1]  }
  0xbb   :  { %v3887_v14 = vld [vmem:[%s7751_s0 + $0x249] sm:$0x4]   ;;  %v2253_v22 = vsel %vm5_vm0, %v3886_v13, %v3885_v8  ;;  %v2242_v15 = vsel %vm29_vm6, %v3883_v7, %v2238_v33  ;;  %v3903_v51 = vld [vmem:[%s7751_s0 + $0x129] sm:$0x2]   ;;  %v2308_v8 = vsel %vm25_vm5, %v3900_v43, %v2304_v4  ;;  %v3922_v33 = vld [vmem:[%s7751_s0 + $0x47] sm:$0x4]  }
  0xbc   :  { %v6373_v9 = vpop.permute.xlu0 %822   ;;  %v3888_v17 = vld [vmem:[%s7751_s0 + $0x268] sm:$0x8]   ;;  %v2257_v30 = vsel %vm9_vm1, %v3887_v14, %v2253_v22  ;;  %2243 = vrot.lane.b32.xlu1 %v2242_v15, %s4205_s28  ;;  %v2322_v55 = vsel %vm5_vm0, %v3903_v51, %v3902_v50  ;;  %v3904_v57 = vld [vmem:[%s7751_s0 + $0x148] sm:$0x4]   ;;  %v2312_v20 = vsel %vm29_vm6, %v3901_v49, %v2308_v8  ;;  %v3924_v15 = vld [vmem:[%s7751_s0 + $0x85] sm:$0x10]  }
  0xbd   :  { %v3889_v23 = vld [vmem:[%s7751_s0 + $0x287] sm:$0x10]   ;;  %v2261_v37 = vsel %vm13_vm2, %v3888_v17, %v2257_v30  ;;  %v3905_v58 = vld [vmem:[%s7751_s0 + $0x167] sm:$0x8]   ;;  %v2326_v62 = vsel %vm9_vm1, %v3904_v57, %v2322_v55  ;;  %444 = vst.msk [vmem:[%s7752_s1] sm:$0xff] %vm443_vm11, %v5963_v54   ;;  %3442 = vst.msk [vmem:[%s7752_s1 + $0x8] sm:$0xff] %vm443_vm11, %v6001_v10  }
  0xbe   :  { %v3890_v24 = vld [vmem:[%s7751_s0 + $0x2a6] sm:$0x20]   ;;  %v2265_v35 = vsel %vm17_vm3, %v3889_v23, %v2261_v37  ;;  %v3906_v16 = vld [vmem:[%s7751_s0 + $0x186] sm:$0x10]   ;;  %v6482_v2 = vpop.permute.xlu1 %926   ;;  %v2330_v5 = vsel %vm13_vm2, %v3905_v58, %v2326_v62  ;;  %v3923_v37 = vld [vmem:[%s7751_s0 + $0x66] sm:$0x8]  }
  0xbf   :  { %v3891_v26 = vld [vmem:[%s7751_s0 + $0x2c5] sm:$0x40]   ;;  %v2269_v34 = vsel %vm21_vm4, %v3890_v24, %v2265_v35  ;;  %v3907_v48 = vld [vmem:[%s7751_s0 + $0x1a5] sm:$0x20]   ;;  %v2334_v11 = vsel %vm17_vm3, %v3906_v16, %v2330_v5  ;;  %v3925_v35 = vld [vmem:[%s7751_s0 + $0xa4] sm:$0x20]  }
  0xc0   :  { %v3892_v31 = vld [vmem:[%s7751_s0 + $0x2e4] sm:$0x80]   ;;  %v6444_v46 = vpop.permute.xlu0 %891   ;;  %v2273_v52 = vsel %vm25_vm5, %v3891_v26, %v2269_v34  ;;  %v3908_v63 = vld [vmem:[%s7751_s0 + $0x1c4] sm:$0x40]   ;;  %v2338_v21 = vsel %vm21_vm4, %v3907_v48, %v2334_v11  ;;  %v3920_v26 = vld [vmem:[%s7751_s0 + $0x9] sm:$0x1]   ;;  %2313 = vrot.lane.b32.xlu1 %v2312_v20, %s4206_s30 }
  0xc1   :  { %v2277_v60 = vsel %vm29_vm6, %v3892_v31, %v2273_v52  ;;  %v3909_v0 = vld [vmem:[%s7751_s0 + $0x1e3] sm:$0x80]   ;;  %v2342_v30 = vsel %vm25_vm5, %v3908_v63, %v2338_v21  ;;  %v2392_v40 = vsel %vm5_vm0, %v3921_v32, %v3920_v26  ;;  %v3927_v34 = vld [vmem:[%s7751_s0 + $0xe2] sm:$0x80]   ;;  %3451 = vst.msk [vmem:[%s7752_s1 + $0x10] sm:$0xff] %vm443_vm11, %v6027_v25   ;;  %vm963_vm7 = vcmask 786144  }
  0xc2   :  { %2278 = vrot.lane.b32.xlu0 %v2277_v60, %s4205_s28  ;;  %v3911_v29 = vld [vmem:[%s7751_s0 + $0x20a] sm:$0x1]   ;;  %v2346_v3 = vsel %vm29_vm6, %v3909_v0, %v2342_v30  ;;  %v6546_v42 = vpop.permute.xlu1 %995   ;;  %v2396_v43 = vsel %vm9_vm1, %v3922_v33, %v2392_v40  ;;  %v3929_v54 = vld [vmem:[%s7751_s0 + $0x128] sm:$0x2]   ;;  %548 = vst.msk [vmem:[%s7752_s1] sm:$0xff] %vm547_vm12, %v6062_v44   ;;  %s4211_s28 = smov 20  }
  0xc3   :  { %v3912_v6 = vld [vmem:[%s7751_s0 + $0x229] sm:$0x2]   ;;  %v2400_v50 = vsel %vm13_vm2, %v3923_v37, %v2396_v43  ;;  %v3930_v10 = vld [vmem:[%s7751_s0 + $0x147] sm:$0x4]   ;;  %v2426_v53 = vsel %vm5_vm0, %v3929_v54, %v3928_v47  ;;  %3468 = vst.msk [vmem:[%s7752_s1 + $0x8] sm:$0xff] %vm547_vm12, %v6099_v1   ;;  %3477 = vst.msk [vmem:[%s7752_s1 + $0x10] sm:$0xff] %vm547_vm12, %v6125_v18  }
  0xc4   :  { %v3913_v7 = vld [vmem:[%s7751_s0 + $0x248] sm:$0x4]   ;;  %v2357_v12 = vsel %vm5_vm0, %v3912_v6, %v3911_v29  ;;  %v6520_v28 = vpop.permute.xlu0 %961   ;;  %v3931_v51 = vld [vmem:[%s7751_s0 + $0x166] sm:$0x8]   ;;  %v2404_v52 = vsel %vm17_vm3, %v3924_v15, %v2400_v50  ;;  %v2430_v18 = vsel %vm9_vm1, %v3930_v10, %v2426_v53  ;;  %v3946_v20 = vld [vmem:[%s7751_s0 + $0x8] sm:$0x1]  }
  0xc5   :  { %v3914_v13 = vld [vmem:[%s7751_s0 + $0x267] sm:$0x8]   ;;  %v2361_v22 = vsel %vm9_vm1, %v3913_v7, %v2357_v12  ;;  %v3932_v55 = vld [vmem:[%s7751_s0 + $0x185] sm:$0x10]   ;;  %v2408_v1 = vsel %vm21_vm4, %v3925_v35, %v2404_v52  ;;  %v2434_v48 = vsel %vm13_vm2, %v3931_v51, %v2430_v18  ;;  %v3947_v21 = vld [vmem:[%s7751_s0 + $0x27] sm:$0x2]  }
  0xc6   :  { %v3915_v14 = vld [vmem:[%s7751_s0 + $0x286] sm:$0x10]   ;;  %v2365_v31 = vsel %vm13_vm2, %v3914_v13, %v2361_v22  ;;  %2347 = vrot.lane.b32.xlu0 %v2346_v3, %s4206_s30  ;;  %v3933_v57 = vld [vmem:[%s7751_s0 + $0x1a4] sm:$0x20]   ;;  %v2412_v62 = vsel %vm25_vm5, %v3926_v41, %v2408_v1  ;;  %v2438_v6 = vsel %vm17_vm3, %v3932_v55, %v2434_v48  ;;  %v6645_v13 = vpop.permute.xlu1 %1065   ;;  %v3948_v22 = vld [vmem:[%s7751_s0 + $0x46] sm:$0x4]   ;;  %v2496_v26 = vsel %vm5_vm0, %v3947_v21, %v3946_v20 }
  0xc7   :  { %v3916_v17 = vld [vmem:[%s7751_s0 + $0x2a5] sm:$0x20]   ;;  %v2369_v38 = vsel %vm17_vm3, %v3915_v14, %v2365_v31  ;;  %v3934_v58 = vld [vmem:[%s7751_s0 + $0x1c3] sm:$0x40]   ;;  %v2416_v29 = vsel %vm29_vm6, %v3927_v34, %v2412_v62  ;;  %v2442_v14 = vsel %vm21_vm4, %v3933_v57, %v2438_v6  ;;  %v3949_v30 = vld [vmem:[%s7751_s0 + $0x65] sm:$0x8]   ;;  %v2500_v3 = vsel %vm9_vm1, %v3948_v22, %v2496_v26 }
  0xc8   :  { %v3917_v23 = vld [vmem:[%s7751_s0 + $0x2c4] sm:$0x40]   ;;  %v2373_v45 = vsel %vm21_vm4, %v3916_v17, %v2369_v38  ;;  %v6607_v44 = vpop.permute.xlu0 %1030   ;;  %v3935_v16 = vld [vmem:[%s7751_s0 + $0x1e2] sm:$0x80]   ;;  %v3950_v31 = vld [vmem:[%s7751_s0 + $0x84] sm:$0x10]   ;;  %v2504_v41 = vsel %vm13_vm2, %v3949_v30, %v2500_v3 }
  0xc9   :  { %v3918_v24 = vld [vmem:[%s7751_s0 + $0x2e3] sm:$0x80]   ;;  %v2377_v49 = vsel %vm25_vm5, %v3917_v23, %v2373_v45  ;;  %v3937_v60 = vld [vmem:[%s7751_s0 + $0x209] sm:$0x1]   ;;  %v2446_v23 = vsel %vm25_vm5, %v3934_v58, %v2442_v14  ;;  %v3951_v32 = vld [vmem:[%s7751_s0 + $0xa3] sm:$0x20]  }
  0xca   :  { %v2381_v25 = vsel %vm29_vm6, %v3918_v24, %v2377_v49  ;;  %v3938_v61 = vld [vmem:[%s7751_s0 + $0x228] sm:$0x2]   ;;  %2417 = vrot.lane.b32.xlu0 %v2416_v29, %s4207_s29  ;;  %v2450_v33 = vsel %vm29_vm6, %v3935_v16, %v2446_v23  ;;  %v3952_v38 = vld [vmem:[%s7751_s0 + $0xc2] sm:$0x40]   ;;  %v2508_v49 = vsel %vm17_vm3, %v3950_v31, %v2504_v41  ;;  %v3974_v21 = vld [vmem:[%s7751_s0 + $0x45] sm:$0x4]  }
  0xcb   :  { %2382 = vrot.lane.b32.xlu1 %v2381_v25, %s4206_s30  ;;  %v2461_v63 = vsel %vm5_vm0, %v3938_v61, %v3937_v60  ;;  %v3939_v0 = vld [vmem:[%s7751_s0 + $0x247] sm:$0x4]   ;;  %v3953_v40 = vld [vmem:[%s7751_s0 + $0xe1] sm:$0x80]   ;;  %v2512_v52 = vsel %vm21_vm4, %v3951_v32, %v2508_v49  ;;  %v3975_v22 = vld [vmem:[%s7751_s0 + $0x64] sm:$0x8]  }
  0xcc   :  { %v3940_v4 = vld [vmem:[%s7751_s0 + $0x266] sm:$0x8]   ;;  %v2465_v7 = vsel %vm9_vm1, %v3939_v0, %v2461_v63  ;;  %v6680_v15 = vpop.permute.xlu0 %1099   ;;  %v3954_v45 = vld [vmem:[%s7751_s0 + $0x108] sm:$0x1]   ;;  %v2516_v1 = vsel %vm25_vm5, %v3952_v38, %v2512_v52  ;;  %v3976_v23 = vld [vmem:[%s7751_s0 + $0x83] sm:$0x10]  }
  0xcd   :  { %v3941_v5 = vld [vmem:[%s7751_s0 + $0x285] sm:$0x10]   ;;  %v2469_v17 = vsel %vm13_vm2, %v3940_v4, %v2465_v7  ;;  %v3955_v43 = vld [vmem:[%s7751_s0 + $0x127] sm:$0x2]   ;;  %v2520_v62 = vsel %vm29_vm6, %v3953_v40, %v2516_v1  ;;  %v3977_v31 = vld [vmem:[%s7751_s0 + $0xa2] sm:$0x20]  }
  0xce   :  { %v3942_v8 = vld [vmem:[%s7751_s0 + $0x2a4] sm:$0x20]   ;;  %v2473_v24 = vsel %vm17_vm3, %v3941_v5, %v2469_v17  ;;  %v3956_v34 = vld [vmem:[%s7751_s0 + $0x146] sm:$0x4]   ;;  %v2530_v50 = vsel %vm5_vm0, %v3955_v43, %v3954_v45  ;;  %v3978_v32 = vld [vmem:[%s7751_s0 + $0xc1] sm:$0x40]  }
  0xcf   :  { %v3943_v11 = vld [vmem:[%s7751_s0 + $0x2c3] sm:$0x40]   ;;  %v2477_v37 = vsel %vm21_vm4, %v3942_v8, %v2473_v24  ;;  %2451 = vrot.lane.b32.xlu1 %v2450_v33, %s4207_s29  ;;  %v3957_v54 = vld [vmem:[%s7751_s0 + $0x165] sm:$0x8]   ;;  %v2534_v53 = vsel %vm9_vm1, %v3956_v34, %v2530_v50  ;;  %v3979_v33 = vld [vmem:[%s7751_s0 + $0xe0] sm:$0x80]  }
  0xd0   :  { %v3944_v12 = vld [vmem:[%s7751_s0 + $0x2e2] sm:$0x80]   ;;  %v2481_v35 = vsel %vm25_vm5, %v3943_v11, %v2477_v37  ;;  %v3958_v10 = vld [vmem:[%s7751_s0 + $0x184] sm:$0x10]   ;;  %v2538_v18 = vsel %vm13_vm2, %v3957_v54, %v2534_v53  ;;  %v6743_v29 = vpop.permute.xlu0 %1169   ;;  %v3972_v11 = vld [vmem:[%s7751_s0 + $0x7] sm:$0x1]  }
  0xd1   :  { %v2485_v47 = vsel %vm29_vm6, %v3944_v12, %v2481_v35  ;;  %v3959_v51 = vld [vmem:[%s7751_s0 + $0x1a3] sm:$0x20]   ;;  %v2542_v48 = vsel %vm17_vm3, %v3958_v10, %v2538_v18  ;;  %v3973_v12 = vld [vmem:[%s7751_s0 + $0x26] sm:$0x2]   ;;  %652 = vst.msk [vmem:[%s7752_s1] sm:$0xff] %vm651_vm13, %v6160_v39   ;;  %3494 = vst.msk [vmem:[%s7752_s1 + $0x8] sm:$0xff] %vm651_vm13, %v6206_v59  }
  0xd2   :  { %2486 = vrot.lane.b32.xlu0 %v2485_v47, %s4207_s29  ;;  %v3960_v55 = vld [vmem:[%s7751_s0 + $0x1c2] sm:$0x40]   ;;  %v2546_v6 = vsel %vm21_vm4, %v3959_v51, %v2542_v48  ;;  %v2600_v20 = vsel %vm5_vm0, %v3973_v12, %v3972_v11  ;;  %v3980_v40 = vld [vmem:[%s7751_s0 + $0x107] sm:$0x1]   ;;  %3503 = vst.msk [vmem:[%s7752_s1 + $0x10] sm:$0xff] %vm651_vm13, %v6243_v19   ;;  %s4212_s30 = smov 16  }
  0xd3   :  { %v3961_v57 = vld [vmem:[%s7751_s0 + $0x1e1] sm:$0x80]   ;;  %2521 = vrot.lane.b32.xlu1 %v2520_v62, %s4208_s12  ;;  %v2550_v14 = vsel %vm25_vm5, %v3960_v55, %v2546_v6  ;;  %v2604_v30 = vsel %vm9_vm1, %v3974_v21, %v2600_v20  ;;  %v3981_v35 = vld [vmem:[%s7751_s0 + $0x126] sm:$0x2]   ;;  %756 = vst.msk [vmem:[%s7752_s1] sm:$0xff] %vm755_vm14, %v6269_v36   ;;  %vm1067_vm8 = vcmask 753344  }
  0xd4   :  { %v6706_v25 = vpop.permute.xlu1 %1134   ;;  %v3963_v58 = vld [vmem:[%s7751_s0 + $0x208] sm:$0x1]   ;;  %v2554_v24 = vsel %vm29_vm6, %v3961_v57, %v2550_v14  ;;  %v2608_v38 = vsel %vm13_vm2, %v3975_v22, %v2604_v30  ;;  %v2634_v39 = vsel %vm5_vm0, %v3981_v35, %v3980_v40  ;;  %v3982_v59 = vld [vmem:[%s7751_s0 + $0x145] sm:$0x4]   ;;  %3520 = vst.msk [vmem:[%s7752_s1 + $0x8] sm:$0xff] %vm755_vm14, %v6312_v56   ;;  %3529 = vst.msk [vmem:[%s7752_s1 + $0x10] sm:$0xff] %vm755_vm14, %v6373_v9  }
  0xd5   :  { %v3964_v16 = vld [vmem:[%s7751_s0 + $0x227] sm:$0x2]   ;;  %v2612_v45 = vsel %vm17_vm3, %v3976_v23, %v2608_v38  ;;  %v3983_v43 = vld [vmem:[%s7751_s0 + $0x164] sm:$0x8]   ;;  %v2638_v50 = vsel %vm9_vm1, %v3982_v59, %v2634_v39  ;;  %v3999_v6 = vld [vmem:[%s7751_s0 + $0x25] sm:$0x2]  }
  0xd6   :  { %v3965_v60 = vld [vmem:[%s7751_s0 + $0x246] sm:$0x4]   ;;  %v2565_v63 = vsel %vm5_vm0, %v3964_v16, %v3963_v58  ;;  %2555 = vrot.lane.b32.xlu0 %v2554_v24, %s4208_s12  ;;  %v3984_v34 = vld [vmem:[%s7751_s0 + $0x183] sm:$0x10]   ;;  %v2616_v49 = vsel %vm21_vm4, %v3977_v31, %v2612_v45  ;;  %v2642_v56 = vsel %vm13_vm2, %v3983_v43, %v2638_v50  ;;  %v4003_v20 = vld [vmem:[%s7751_s0 + $0xa1] sm:$0x20]  }
  0xd7   :  { %v3966_v61 = vld [vmem:[%s7751_s0 + $0x265] sm:$0x8]   ;;  %v2569_v7 = vsel %vm9_vm1, %v3965_v60, %v2565_v63  ;;  %v6816_v19 = vpop.permute.xlu0 %1238   ;;  %v3985_v54 = vld [vmem:[%s7751_s0 + $0x1a2] sm:$0x20]   ;;  %v2620_v36 = vsel %vm25_vm5, %v3978_v32, %v2616_v49  ;;  %v2646_v57 = vsel %vm17_vm3, %v3984_v34, %v2642_v56  ;;  %v4004_v21 = vld [vmem:[%s7751_s0 + $0xc0] sm:$0x40]  }
  0xd8   :  { %v3967_v0 = vld [vmem:[%s7751_s0 + $0x284] sm:$0x10]   ;;  %v2573_v17 = vsel %vm13_vm2, %v3966_v61, %v2569_v7  ;;  %v6781_v37 = vpop.permute.xlu1 %1203   ;;  %v3986_v10 = vld [vmem:[%s7751_s0 + $0x1c1] sm:$0x40]   ;;  %v2624_v55 = vsel %vm29_vm6, %v3979_v33, %v2620_v36  ;;  %v2650_v61 = vsel %vm21_vm4, %v3985_v54, %v2646_v57  ;;  %v4000_v7 = vld [vmem:[%s7751_s0 + $0x44] sm:$0x4]  }
  0xd9   :  { %v3968_v4 = vld [vmem:[%s7751_s0 + $0x2a3] sm:$0x20]   ;;  %v2577_v26 = vsel %vm17_vm3, %v3967_v0, %v2573_v17  ;;  %v3987_v51 = vld [vmem:[%s7751_s0 + $0x1e0] sm:$0x80]   ;;  %v3998_v0 = vld [vmem:[%s7751_s0 + $0x6] sm:$0x1]  }
  0xda   :  { %v3969_v5 = vld [vmem:[%s7751_s0 + $0x2c2] sm:$0x40]   ;;  %v2581_v3 = vsel %vm21_vm4, %v3968_v4, %v2577_v26  ;;  %v3989_v9 = vld [vmem:[%s7751_s0 + $0x207] sm:$0x1]   ;;  %2625 = vrot.lane.b32.xlu0 %v2624_v55, %s4209_s23  ;;  %v2654_v4 = vsel %vm25_vm5, %v3986_v10, %v2650_v61  ;;  %v2704_v14 = vsel %vm5_vm0, %v3999_v6, %v3998_v0  ;;  %v4002_v17 = vld [vmem:[%s7751_s0 + $0x82] sm:$0x10]  }
  0xdb   :  { %v3970_v8 = vld [vmem:[%s7751_s0 + $0x2e1] sm:$0x80]   ;;  %v2585_v41 = vsel %vm25_vm5, %v3969_v5, %v2581_v3  ;;  %v3990_v52 = vld [vmem:[%s7751_s0 + $0x226] sm:$0x2]   ;;  %v2658_v11 = vsel %vm29_vm6, %v3987_v51, %v2654_v4  ;;  %v6906_v22 = vpop.permute.xlu0 %1307   ;;  %v2708_v24 = vsel %vm9_vm1, %v4000_v7, %v2704_v14  ;;  %v4005_v26 = vld [vmem:[%s7751_s0 + $0xdf] sm:$0x80]  }
  0xdc   :  { %v2589_v47 = vsel %vm29_vm6, %v3970_v8, %v2585_v41  ;;  %v3991_v53 = vld [vmem:[%s7751_s0 + $0x245] sm:$0x4]   ;;  %v2669_v58 = vsel %vm5_vm0, %v3990_v52, %v3989_v9  ;;  %v6869_v60 = vpop.permute.xlu1 %1273   ;;  %v4001_v8 = vld [vmem:[%s7751_s0 + $0x63] sm:$0x8]   ;;  %v4026_v0 = vld [vmem:[%s7751_s0 + $0x43] sm:$0x4]  }
  0xdd   :  { %2590 = vrot.lane.b32.xlu1 %v2589_v47, %s4208_s12  ;;  %v3992_v1 = vld [vmem:[%s7751_s0 + $0x264] sm:$0x8]   ;;  %v2673_v62 = vsel %vm9_vm1, %v3991_v53, %v2669_v58  ;;  %v4006_v30 = vld [vmem:[%s7751_s0 + $0x106] sm:$0x1]   ;;  %v2712_v32 = vsel %vm13_vm2, %v4001_v8, %v2708_v24  ;;  %v4027_v7 = vld [vmem:[%s7751_s0 + $0x62] sm:$0x8]  }
  0xde   :  { %v3993_v18 = vld [vmem:[%s7751_s0 + $0x283] sm:$0x10]   ;;  %v2677_v5 = vsel %vm13_vm2, %v3992_v1, %v2673_v62  ;;  %v4007_v33 = vld [vmem:[%s7751_s0 + $0x125] sm:$0x2]   ;;  %v2716_v35 = vsel %vm17_vm3, %v4002_v17, %v2712_v32  ;;  %v4028_v8 = vld [vmem:[%s7751_s0 + $0x81] sm:$0x10]  }
  0xdf   :  { %v3994_v16 = vld [vmem:[%s7751_s0 + $0x2a2] sm:$0x20]   ;;  %v2681_v12 = vsel %vm17_vm3, %v3993_v18, %v2677_v5  ;;  %v4008_v3 = vld [vmem:[%s7751_s0 + $0x144] sm:$0x4]   ;;  %v2738_v41 = vsel %vm5_vm0, %v4007_v33, %v4006_v30  ;;  %v2720_v34 = vsel %vm21_vm4, %v4003_v20, %v2716_v35  ;;  %v6966_v53 = vpop.permute.xlu0 %1377   ;;  %860 = vst.msk [vmem:[%s7752_s1] sm:$0xff] %vm859_vm15, %v6398_v27   ;;  %3546 = vst.msk [vmem:[%s7752_s1 + $0x8] sm:$0xff] %vm859_vm15, %v6444_v46  }
  0xe0   :  { %v3995_v48 = vld [vmem:[%s7751_s0 + $0x2c1] sm:$0x40]   ;;  %v2685_v23 = vsel %vm21_vm4, %v3994_v16, %v2681_v12  ;;  %v4009_v38 = vld [vmem:[%s7751_s0 + $0x163] sm:$0x8]   ;;  %v6940_v43 = vpop.permute.xlu1 %1342   ;;  %v2742_v47 = vsel %vm9_vm1, %v4008_v3, %v2738_v41  ;;  %v2724_v10 = vsel %vm25_vm5, %v4004_v21, %v2720_v34  ;;  %v4030_v21 = vld [vmem:[%s7751_s0 + $0xbf] sm:$0x40]  }
  0xe1   :  { %v3996_v63 = vld [vmem:[%s7751_s0 + $0x2e0] sm:$0x80]   ;;  %2659 = vrot.lane.b32.xlu1 %v2658_v11, %s4209_s23  ;;  %v2689_v31 = vsel %vm25_vm5, %v3995_v48, %v2685_v23  ;;  %v4010_v45 = vld [vmem:[%s7751_s0 + $0x182] sm:$0x10]   ;;  %v2746_v51 = vsel %vm13_vm2, %v4009_v38, %v2742_v47  ;;  %v2728_v55 = vsel %vm29_vm6, %v4005_v26, %v2724_v10  ;;  %v4024_v48 = vld [vmem:[%s7751_s0 + $0x5] sm:$0x1]  }
  0xe2   :  { %v2693_v40 = vsel %vm29_vm6, %v3996_v63, %v2689_v31  ;;  %v4011_v39 = vld [vmem:[%s7751_s0 + $0x1a1] sm:$0x20]   ;;  %v2750_v57 = vsel %vm17_vm3, %v4010_v45, %v2746_v51  ;;  %v4025_v63 = vld [vmem:[%s7751_s0 + $0x24] sm:$0x2]   ;;  %3555 = vst.msk [vmem:[%s7752_s1 + $0x10] sm:$0xff] %vm859_vm15, %v6482_v2   ;;  %vm1171_vm9 = vcmask 720544  }
  0xe3   :  { %v4012_v59 = vld [vmem:[%s7751_s0 + $0x1c0] sm:$0x40]   ;;  %2694 = vrot.lane.b32.xlu0 %v2693_v40, %s4209_s23  ;;  %v2754_v61 = vsel %vm21_vm4, %v4011_v39, %v2750_v57  ;;  %v2808_v6 = vsel %vm5_vm0, %v4025_v63, %v4024_v48  ;;  %v4029_v11 = vld [vmem:[%s7751_s0 + $0xa0] sm:$0x20]   ;;  %964 = vst.msk [vmem:[%s7752_s1] sm:$0xff] %vm963_vm7, %v6520_v28   ;;  %s4213_s9 = smov 12  }
  0xe4   :  { %v4013_v49 = vld [vmem:[%s7751_s0 + $0x1df] sm:$0x80]   ;;  %v2758_v4 = vsel %vm25_vm5, %v4012_v59, %v2754_v61  ;;  %v7004_v12 = vpop.permute.xlu1 %1411   ;;  %v2812_v20 = vsel %vm9_vm1, %v4026_v0, %v2808_v6  ;;  %v4031_v23 = vld [vmem:[%s7751_s0 + $0xde] sm:$0x80]   ;;  %v4051_v28 = vld [vmem:[%s7751_s0 + $0x23] sm:$0x2]  }
  0xe5   :  { %v4015_v50 = vld [vmem:[%s7751_s0 + $0x206] sm:$0x1]   ;;  %2729 = vrot.lane.b32.xlu1 %v2728_v55, %s4210_s15  ;;  %v2762_v14 = vsel %vm29_vm6, %v4013_v49, %v2758_v4  ;;  %v2816_v26 = vsel %vm13_vm2, %v4027_v7, %v2812_v20  ;;  %v4032_v27 = vld [vmem:[%s7751_s0 + $0x105] sm:$0x1]   ;;  %v4053_v48 = vld [vmem:[%s7751_s0 + $0x61] sm:$0x8]  }
  0xe6   :  { %v4016_v54 = vld [vmem:[%s7751_s0 + $0x225] sm:$0x2]   ;;  %v4033_v46 = vld [vmem:[%s7751_s0 + $0x124] sm:$0x2]   ;;  %v2820_v31 = vsel %vm17_vm3, %v4028_v8, %v2816_v26  ;;  %3572 = vst.msk [vmem:[%s7752_s1 + $0x8] sm:$0xff] %vm963_vm7, %v6546_v42   ;;  %3581 = vst.msk [vmem:[%s7752_s1 + $0x10] sm:$0xff] %vm963_vm7, %v6607_v44  }
  0xe7   :  { %v2773_v36 = vsel %vm5_vm0, %v4016_v54, %v4015_v50  ;;  %v4017_v56 = vld [vmem:[%s7751_s0 + $0x244] sm:$0x4]   ;;  %2763 = vrot.lane.b32.xlu0 %v2762_v14, %s4210_s15  ;;  %v4034_v30 = vld [vmem:[%s7751_s0 + $0x143] sm:$0x4]   ;;  %v2842_v32 = vsel %vm5_vm0, %v4033_v46, %v4032_v27  ;;  %v2824_v35 = vsel %vm21_vm4, %v4029_v11, %v2820_v31  ;;  %v4054_v4 = vld [vmem:[%s7751_s0 + $0x80] sm:$0x10]  }
  0xe8   :  { %v4018_v9 = vld [vmem:[%s7751_s0 + $0x263] sm:$0x8]   ;;  %v2777_v58 = vsel %vm9_vm1, %v4017_v56, %v2773_v36  ;;  %v4035_v33 = vld [vmem:[%s7751_s0 + $0x162] sm:$0x8]   ;;  %v2846_v41 = vsel %vm9_vm1, %v4034_v30, %v2842_v32  ;;  %v2828_v34 = vsel %vm25_vm5, %v4030_v21, %v2824_v35  ;;  %v7076_v10 = vpop.permute.xlu1 %1481   ;;  %v4056_v6 = vld [vmem:[%s7751_s0 + $0xbe] sm:$0x40]  }
  0xe9   :  { %v4019_v52 = vld [vmem:[%s7751_s0 + $0x282] sm:$0x10]   ;;  %v2781_v62 = vsel %vm13_vm2, %v4018_v9, %v2777_v58  ;;  %v4036_v3 = vld [vmem:[%s7751_s0 + $0x181] sm:$0x10]   ;;  %v2850_v47 = vsel %vm13_vm2, %v4035_v33, %v2846_v41  ;;  %v2832_v51 = vsel %vm29_vm6, %v4031_v23, %v2828_v34  ;;  %v4057_v11 = vld [vmem:[%s7751_s0 + $0xdd] sm:$0x80]  }
  0xea   :  { %v4020_v1 = vld [vmem:[%s7751_s0 + $0x2a1] sm:$0x20]   ;;  %v2785_v5 = vsel %vm17_vm3, %v4019_v52, %v2781_v62  ;;  %v4037_v38 = vld [vmem:[%s7751_s0 + $0x1a0] sm:$0x20]   ;;  %v2854_v36 = vsel %vm17_vm3, %v4036_v3, %v2850_v47  ;;  %v4052_v62 = vld [vmem:[%s7751_s0 + $0x42] sm:$0x4]  }
  0xeb   :  { %v4021_v18 = vld [vmem:[%s7751_s0 + $0x2c0] sm:$0x40]   ;;  %v2789_v17 = vsel %vm21_vm4, %v4020_v1, %v2785_v5  ;;  %v4038_v45 = vld [vmem:[%s7751_s0 + $0x1bf] sm:$0x40]   ;;  %2833 = vrot.lane.b32.xlu0 %v2832_v51, %s4211_s28  ;;  %v2858_v57 = vsel %vm21_vm4, %v4037_v38, %v2854_v36  ;;  %v4055_v5 = vld [vmem:[%s7751_s0 + $0x9f] sm:$0x20]  }
  0xec   :  { %v4022_v16 = vld [vmem:[%s7751_s0 + $0x2df] sm:$0x80]   ;;  %v2793_v24 = vsel %vm25_vm5, %v4021_v18, %v2789_v17  ;;  %v7051_v40 = vpop.permute.xlu0 %1446   ;;  %v4039_v39 = vld [vmem:[%s7751_s0 + $0x1de] sm:$0x80]   ;;  %v4050_v18 = vld [vmem:[%s7751_s0 + $0x4] sm:$0x1]  }
  0xed   :  { %v2797_v2 = vsel %vm29_vm6, %v4022_v16, %v2793_v24  ;;  %v4041_v59 = vld [vmem:[%s7751_s0 + $0x205] sm:$0x1]   ;;  %v2862_v16 = vsel %vm25_vm5, %v4038_v45, %v2858_v57  ;;  %v2912_v0 = vsel %vm5_vm0, %v4051_v28, %v4050_v18  ;;  %v4058_v14 = vld [vmem:[%s7751_s0 + $0x104] sm:$0x1]   ;;  %v4076_v57 = vld [vmem:[%s7751_s0 + $0x3] sm:$0x1]  }
  0xee   :  { %2798 = vrot.lane.b32.xlu1 %v2797_v2, %s4210_s15  ;;  %v4042_v49 = vld [vmem:[%s7751_s0 + $0x224] sm:$0x2]   ;;  %v2866_v44 = vsel %vm29_vm6, %v4039_v39, %v2862_v16  ;;  %v2916_v8 = vsel %vm9_vm1, %v4052_v62, %v2912_v0  ;;  %v4059_v17 = vld [vmem:[%s7751_s0 + $0x123] sm:$0x2]   ;;  %v4077_v18 = vld [vmem:[%s7751_s0 + $0x22] sm:$0x2]  }
  0xef   :  { %v4043_v50 = vld [vmem:[%s7751_s0 + $0x243] sm:$0x4]   ;;  %v2877_v56 = vsel %vm5_vm0, %v4042_v49, %v4041_v59  ;;  %v2920_v21 = vsel %vm13_vm2, %v4053_v48, %v2916_v8  ;;  %v2946_v23 = vsel %vm5_vm0, %v4059_v17, %v4058_v14  ;;  %v4060_v24 = vld [vmem:[%s7751_s0 + $0x142] sm:$0x4]   ;;  %v7160_v46 = vpop.permute.xlu1 %1550   ;;  %v4078_v16 = vld [vmem:[%s7751_s0 + $0x41] sm:$0x4]  }
  0xf0   :  { %v4044_v54 = vld [vmem:[%s7751_s0 + $0x262] sm:$0x8]   ;;  %v2881_v58 = vsel %vm9_vm1, %v4043_v50, %v2877_v56  ;;  %v7122_v42 = vpop.permute.xlu0 %1515   ;;  %v4061_v26 = vld [vmem:[%s7751_s0 + $0x161] sm:$0x8]   ;;  %v2924_v2 = vsel %vm17_vm3, %v4054_v4, %v2920_v21  ;;  %v2950_v31 = vsel %vm9_vm1, %v4060_v24, %v2946_v23  ;;  %v4081_v0 = vld [vmem:[%s7751_s0 + $0x9e] sm:$0x20]  }
  0xf1   :  { %v4045_v9 = vld [vmem:[%s7751_s0 + $0x281] sm:$0x10]   ;;  %v2885_v61 = vsel %vm13_vm2, %v4044_v54, %v2881_v58  ;;  %v4062_v27 = vld [vmem:[%s7751_s0 + $0x180] sm:$0x10]   ;;  %v2928_v38 = vsel %vm21_vm4, %v4055_v5, %v2924_v2  ;;  %v2954_v35 = vsel %vm13_vm2, %v4061_v26, %v2950_v31  ;;  %v4082_v4 = vld [vmem:[%s7751_s0 + $0xbd] sm:$0x40]  }
  0xf2   :  { %v4046_v52 = vld [vmem:[%s7751_s0 + $0x2a0] sm:$0x20]   ;;  %v2889_v63 = vsel %vm17_vm3, %v4045_v9, %v2885_v61  ;;  %2867 = vrot.lane.b32.xlu1 %v2866_v44, %s4211_s28  ;;  %v4063_v32 = vld [vmem:[%s7751_s0 + $0x19f] sm:$0x20]   ;;  %v2932_v59 = vsel %vm25_vm5, %v4056_v6, %v2928_v38  ;;  %v2958_v34 = vsel %vm17_vm3, %v4062_v27, %v2954_v35  ;;  %v4079_v61 = vld [vmem:[%s7751_s0 + $0x60] sm:$0x8]   ;;  %v3016_v44 = vsel %vm5_vm0, %v4077_v18, %v4076_v57 }
  0xf3   :  { %v4047_v55 = vld [vmem:[%s7751_s0 + $0x2bf] sm:$0x40]   ;;  %v2893_v7 = vsel %vm21_vm4, %v4046_v52, %v2889_v63  ;;  %v4064_v33 = vld [vmem:[%s7751_s0 + $0x1be] sm:$0x40]   ;;  %v2936_v36 = vsel %vm29_vm6, %v4057_v11, %v2932_v59  ;;  %v2962_v56 = vsel %vm21_vm4, %v4063_v32, %v2958_v34  ;;  %v7224_v28 = vpop.permute.xlu1 %1619   ;;  %v4080_v63 = vld [vmem:[%s7751_s0 + $0x7f] sm:$0x10]   ;;  %v3020_v6 = vsel %vm9_vm1, %v4078_v16, %v3016_v44 }
  0xf4   :  { %v4048_v1 = vld [vmem:[%s7751_s0 + $0x2de] sm:$0x80]   ;;  %v2897_v20 = vsel %vm25_vm5, %v4047_v55, %v2893_v7  ;;  %v4065_v3 = vld [vmem:[%s7751_s0 + $0x1dd] sm:$0x80]   ;;  %v7198_v51 = vpop.permute.xlu0 %1585   ;;  %v2966_v58 = vsel %vm25_vm5, %v4064_v33, %v2962_v56  ;;  %v4083_v7 = vld [vmem:[%s7751_s0 + $0xdc] sm:$0x80]   ;;  %v3024_v14 = vsel %vm13_vm2, %v4079_v61, %v3020_v6 }
  0xf5   :  { %v2901_v30 = vsel %vm29_vm6, %v4048_v1, %v2897_v20  ;;  %v4067_v41 = vld [vmem:[%s7751_s0 + $0x204] sm:$0x1]   ;;  %v2970_v62 = vsel %vm29_vm6, %v4065_v3, %v2966_v58  ;;  %v4084_v8 = vld [vmem:[%s7751_s0 + $0x103] sm:$0x1]   ;;  %1068 = vst.msk [vmem:[%s7752_s1] sm:$0xff] %vm1067_vm8, %v6645_v13   ;;  %3598 = vst.msk [vmem:[%s7752_s1 + $0x8] sm:$0xff] %vm1067_vm8, %v6680_v15   ;;  %v3028_v21 = vsel %vm17_vm3, %v4080_v63, %v3024_v14 }
  0xf6   :  { %2902 = vrot.lane.b32.xlu0 %v2901_v30, %s4211_s28  ;;  %v4068_v45 = vld [vmem:[%s7751_s0 + $0x223] sm:$0x2]   ;;  %2937 = vrot.lane.b32.xlu1 %v2936_v36, %s4212_s30  ;;  %v4085_v13 = vld [vmem:[%s7751_s0 + $0x122] sm:$0x2]   ;;  %s4214_s3 = smov 8   ;;  %vm1275_vm10 = vcmask 687744  }
  0xf7   :  { %v4069_v39 = vld [vmem:[%s7751_s0 + $0x242] sm:$0x4]   ;;  %v2981_v47 = vsel %vm5_vm0, %v4068_v45, %v4067_v41  ;;  %v4086_v15 = vld [vmem:[%s7751_s0 + $0x141] sm:$0x4]   ;;  %3607 = vst.msk [vmem:[%s7752_s1 + $0x10] sm:$0xff] %vm1067_vm8, %v6706_v25   ;;  %v3050_v23 = vsel %vm5_vm0, %v4085_v13, %v4084_v8  ;;  %v7323_v41 = vpop.permute.xlu1 %1689   ;;  %vm1379_vm11 = vcmask 654944  }
  0xf8   :  { %v4070_v49 = vld [vmem:[%s7751_s0 + $0x261] sm:$0x8]   ;;  %v2985_v9 = vsel %vm9_vm1, %v4069_v39, %v2981_v47  ;;  %v4087_v17 = vld [vmem:[%s7751_s0 + $0x160] sm:$0x8]   ;;  %v7270_v25 = vpop.permute.xlu0 %1654   ;;  %1172 = vst.msk [vmem:[%s7752_s1] sm:$0xff] %vm1171_vm9, %v6743_v29   ;;  %3624 = vst.msk [vmem:[%s7752_s1 + $0x8] sm:$0xff] %vm1171_vm9, %v6781_v37   ;;  %v3032_v29 = vsel %vm21_vm4, %v4081_v0, %v3028_v21  ;;  %v3054_v37 = vsel %vm9_vm1, %v4086_v15, %v3050_v23 }
  0xf9   :  { %v4071_v50 = vld [vmem:[%s7751_s0 + $0x280] sm:$0x10]   ;;  %v2989_v1 = vsel %vm13_vm2, %v4070_v49, %v2985_v9  ;;  %v4088_v24 = vld [vmem:[%s7751_s0 + $0x17f] sm:$0x10]   ;;  %3633 = vst.msk [vmem:[%s7752_s1 + $0x10] sm:$0xff] %vm1171_vm9, %v6816_v19   ;;  %v3036_v31 = vsel %vm25_vm5, %v4082_v4, %v3032_v29  ;;  %v3058_v32 = vsel %vm13_vm2, %v4087_v17, %v3054_v37  ;;  %s4215_s29 = smov 4  }
  0xfa   :  { %v4072_v54 = vld [vmem:[%s7751_s0 + $0x29f] sm:$0x20]   ;;  %v2993_v48 = vsel %vm17_vm3, %v4071_v50, %v2989_v1  ;;  %2971 = vrot.lane.b32.xlu0 %v2970_v62, %s4212_s30  ;;  %v4089_v26 = vld [vmem:[%s7751_s0 + $0x19e] sm:$0x20]   ;;  %v3040_v45 = vsel %vm29_vm6, %v4083_v7, %v3036_v31  ;;  %v3062_v39 = vsel %vm17_vm3, %v4088_v24, %v3058_v32  ;;  %v4102_v36 = vld [vmem:[%s7751_s0 + $0x2] sm:$0x1]  }
  0xfb   :  { %v4073_v52 = vld [vmem:[%s7751_s0 + $0x2be] sm:$0x40]   ;;  %v2997_v5 = vsel %vm21_vm4, %v4072_v54, %v2993_v48  ;;  %v4090_v27 = vld [vmem:[%s7751_s0 + $0x1bd] sm:$0x40]   ;;  %v3066_v50 = vsel %vm21_vm4, %v4089_v26, %v3062_v39  ;;  %v4103_v56 = vld [vmem:[%s7751_s0 + $0x21] sm:$0x2]  }
  0xfc   :  { %v4074_v55 = vld [vmem:[%s7751_s0 + $0x2dd] sm:$0x80]   ;;  %v3001_v11 = vsel %vm25_vm5, %v4073_v52, %v2997_v5  ;;  %v4091_v19 = vld [vmem:[%s7751_s0 + $0x1dc] sm:$0x80]   ;;  %v4104_v9 = vld [vmem:[%s7751_s0 + $0x40] sm:$0x4]   ;;  %v3070_v52 = vsel %vm25_vm5, %v4090_v27, %v3066_v50  ;;  %v3120_v57 = vsel %vm5_vm0, %v4103_v56, %v4102_v36  ;;  %v7361_v16 = vpop.permute.xlu0 %1723  }
  0xfd   :  { %v3005_v20 = vsel %vm29_vm6, %v4074_v55, %v3001_v11  ;;  %v4093_v30 = vld [vmem:[%s7751_s0 + $0x203] sm:$0x1]   ;;  %v4105_v58 = vld [vmem:[%s7751_s0 + $0x5f] sm:$0x8]   ;;  %v3074_v61 = vsel %vm29_vm6, %v4091_v19, %v3070_v52  ;;  %v3124_v48 = vsel %vm9_vm1, %v4104_v9, %v3120_v57  ;;  %v4130_v56 = vld [vmem:[%s7751_s0 + $0x3f] sm:$0x4]  }
  0xfe   :  { %3006 = vrot.lane.b32.xlu1 %v3005_v20, %s4212_s30  ;;  %v4094_v2 = vld [vmem:[%s7751_s0 + $0x222] sm:$0x2]   ;;  %3041 = vrot.lane.b32.xlu0 %v3040_v45, %s4213_s9  ;;  %v4106_v1 = vld [vmem:[%s7751_s0 + $0x7e] sm:$0x10]   ;;  %v3128_v4 = vsel %vm13_vm2, %v4105_v58, %v3124_v48  ;;  %vm1795_vm12 = vcmask 523744   ;;  %vm2315_vm13 = vcmask 359744  }
  0xff   :  { %v3085_v33 = vsel %vm5_vm0, %v4094_v2, %v4093_v30  ;;  %v4095_v3 = vld [vmem:[%s7751_s0 + $0x241] sm:$0x4]   ;;  %v4107_v18 = vld [vmem:[%s7751_s0 + $0x9d] sm:$0x20]   ;;  %v3132_v14 = vsel %vm17_vm3, %v4106_v1, %v3128_v4  ;;  %v4131_v9 = vld [vmem:[%s7751_s0 + $0x5e] sm:$0x8]  }
 0x100   :  { %v4096_v38 = vld [vmem:[%s7751_s0 + $0x260] sm:$0x8]   ;;  %v3089_v59 = vsel %vm9_vm1, %v4095_v3, %v3085_v33  ;;  %v4108_v44 = vld [vmem:[%s7751_s0 + $0xbc] sm:$0x40]   ;;  %v3136_v21 = vsel %vm21_vm4, %v4107_v18, %v3132_v14  ;;  %v7421_v31 = vpop.permute.xlu0 %1793   ;;  %v4132_v52 = vld [vmem:[%s7751_s0 + $0x7d] sm:$0x10]  }
 0x101   :  { %v4097_v35 = vld [vmem:[%s7751_s0 + $0x27f] sm:$0x10]   ;;  %v3093_v54 = vsel %vm13_vm2, %v4096_v38, %v3089_v59  ;;  %v4109_v63 = vld [vmem:[%s7751_s0 + $0xdb] sm:$0x80]   ;;  %v3140_v29 = vsel %vm25_vm5, %v4108_v44, %v3136_v21  ;;  %v4133_v18 = vld [vmem:[%s7751_s0 + $0x9c] sm:$0x20]  }
 0x102   :  { %v4098_v34 = vld [vmem:[%s7751_s0 + $0x29e] sm:$0x20]   ;;  %v3097_v55 = vsel %vm17_vm3, %v4097_v35, %v3093_v54  ;;  %3075 = vrot.lane.b32.xlu1 %v3074_v61, %s4213_s9  ;;  %v4110_v5 = vld [vmem:[%s7751_s0 + $0x102] sm:$0x1]   ;;  %v3144_v32 = vsel %vm29_vm6, %v4109_v63, %v3140_v29  ;;  %v4134_v61 = vld [vmem:[%s7751_s0 + $0xbb] sm:$0x40]  }
 0x103   :  { %v4099_v47 = vld [vmem:[%s7751_s0 + $0x2bd] sm:$0x40]   ;;  %v3101_v62 = vsel %vm21_vm4, %v4098_v34, %v3097_v55  ;;  %v4111_v6 = vld [vmem:[%s7751_s0 + $0x121] sm:$0x2]   ;;  %v4136_v63 = vld [vmem:[%s7751_s0 + $0x101] sm:$0x1]  }
 0x104   :  { %v4100_v49 = vld [vmem:[%s7751_s0 + $0x2dc] sm:$0x80]   ;;  %v3105_v0 = vsel %vm25_vm5, %v4099_v47, %v3101_v62  ;;  %v4112_v7 = vld [vmem:[%s7751_s0 + $0x140] sm:$0x4]   ;;  %v7384_v8 = vpop.permute.xlu1 %1758   ;;  %v3154_v13 = vsel %vm5_vm0, %v4111_v6, %v4110_v5  ;;  %v4128_v47 = vld [vmem:[%s7751_s0 + $0x1] sm:$0x1]  }
 0x105   :  { %v3109_v11 = vsel %vm29_vm6, %v4100_v49, %v3105_v0  ;;  %v4113_v15 = vld [vmem:[%s7751_s0 + $0x15f] sm:$0x8]   ;;  %v3158_v23 = vsel %vm9_vm1, %v4112_v7, %v3154_v13  ;;  %v4129_v49 = vld [vmem:[%s7751_s0 + $0x20] sm:$0x2]   ;;  %1276 = vst.msk [vmem:[%s7752_s1] sm:$0xff] %vm1275_vm10, %v6869_v60   ;;  %3650 = vst.msk [vmem:[%s7752_s1 + $0x8] sm:$0xff] %vm1275_vm10, %v6906_v22  }
 0x106   :  { %v4114_v17 = vld [vmem:[%s7751_s0 + $0x17e] sm:$0x10]   ;;  %3110 = vrot.lane.b32.xlu0 %v3109_v11, %s4213_s9  ;;  %v3162_v37 = vsel %vm13_vm2, %v4113_v15, %v3158_v23  ;;  %3145 = vrot.lane.b32.xlu1 %v3144_v32, %s4214_s3  ;;  %v3224_v36 = vsel %vm5_vm0, %v4129_v49, %v4128_v47  ;;  %v4135_v62 = vld [vmem:[%s7751_s0 + $0xda] sm:$0x80]   ;;  %vm2419_vm14 = vcmask 326944   ;;  %vm2523_vm15 = vcmask 294144  }
 0x107   :  { %v4115_v20 = vld [vmem:[%s7751_s0 + $0x19d] sm:$0x20]   ;;  %v3166_v33 = vsel %vm17_vm3, %v4114_v17, %v3162_v37  ;;  %v3228_v1 = vsel %vm9_vm1, %v4130_v56, %v3224_v36  ;;  %v4137_v0 = vld [vmem:[%s7751_s0 + $0x120] sm:$0x2]   ;;  %v1863_v4 = vpop.permute.xlu0 %1862   ;;  %3659 = vst.msk [vmem:[%s7752_s1 + $0x10] sm:$0xff] %vm1275_vm10, %v6940_v43   ;;  %vm2627_vm7 = vcmask 261344  }
 0x108   :  { %v4116_v24 = vld [vmem:[%s7751_s0 + $0x1bc] sm:$0x40]   ;;  %v3170_v39 = vsel %vm21_vm4, %v4115_v20, %v3166_v33  ;;  %v7459_v55 = vpop.permute.xlu1 %1827   ;;  %v3232_v44 = vsel %vm13_vm2, %v4131_v9, %v3228_v1  ;;  %v3258_v60 = vsel %vm5_vm0, %v4137_v0, %v4136_v63  ;;  %v4138_v22 = vld [vmem:[%s7751_s0 + $0x13f] sm:$0x4]   ;;  %1380 = vst.msk [vmem:[%s7752_s1] sm:$0xff] %vm1379_vm11, %v6966_v53   ;;  %3676 = vst.msk [vmem:[%s7752_s1 + $0x8] sm:$0xff] %vm1379_vm11, %v7004_v12  }
 0x109   :  { %v4117_v26 = vld [vmem:[%s7751_s0 + $0x1db] sm:$0x80]   ;;  %v3174_v50 = vsel %vm25_vm5, %v4116_v24, %v3170_v39  ;;  %v3236_v6 = vsel %vm17_vm3, %v4132_v52, %v3232_v44  ;;  %v4139_v7 = vld [vmem:[%s7751_s0 + $0x15e] sm:$0x8]   ;;  %v3262_v13 = vsel %vm9_vm1, %v4138_v22, %v3258_v60  ;;  %3685 = vst.msk [vmem:[%s7752_s1 + $0x10] sm:$0xff] %vm1379_vm11, %v7051_v40   ;;  %vm2731_vm8 = vcmask 228544  }
 0x10a   :  { %v4119_v27 = vld [vmem:[%s7751_s0 + $0x202] sm:$0x1]   ;;  %v3178_v57 = vsel %vm29_vm6, %v4117_v26, %v3174_v50  ;;  %v4140_v11 = vld [vmem:[%s7751_s0 + $0x17d] sm:$0x10]   ;;  %v3240_v14 = vsel %vm21_vm4, %v4133_v18, %v3236_v6  ;;  %v3266_v12 = vsel %vm13_vm2, %v4139_v7, %v3262_v13  ;;  %vm2835_vm9 = vcmask 195744  }
 0x10b   :  { %v4120_v19 = vld [vmem:[%s7751_s0 + $0x221] sm:$0x2]   ;;  %3179 = vrot.lane.b32.xlu0 %v3178_v57, %s4214_s3  ;;  %v4141_v15 = vld [vmem:[%s7751_s0 + $0x19c] sm:$0x20]   ;;  %v3244_v53 = vsel %vm25_vm5, %v4134_v61, %v3240_v14  ;;  %v3270_v26 = vsel %vm17_vm3, %v4140_v11, %v3266_v12  ;;  %vm2939_vm10 = vcmask 162944   ;;  %vm3043_vm11 = vcmask 130144  }
 0x10c   :  { %v4121_v30 = vld [vmem:[%s7751_s0 + $0x240] sm:$0x4]   ;;  %v3189_v3 = vsel %vm5_vm0, %v4120_v19, %v4119_v27  ;;  %v4142_v17 = vld [vmem:[%s7751_s0 + $0x1bb] sm:$0x40]   ;;  %v1898_v23 = vpop.permute.xlu1 %1897   ;;  %v3248_v24 = vsel %vm29_vm6, %v4135_v62, %v3244_v53 }
 0x10d   :  { %v4122_v2 = vld [vmem:[%s7751_s0 + $0x25f] sm:$0x8]   ;;  %v3193_v59 = vsel %vm9_vm1, %v4121_v30, %v3189_v3  ;;  %v4145_v40 = vld [vmem:[%s7751_s0 + $0x201] sm:$0x1]   ;;  %v3274_v30 = vsel %vm21_vm4, %v4141_v15, %v3270_v26 }
 0x10e   :  { %v4123_v38 = vld [vmem:[%s7751_s0 + $0x27e] sm:$0x10]   ;;  %v3197_v54 = vsel %vm13_vm2, %v4122_v2, %v3193_v59  ;;  %v4146_v20 = vld [vmem:[%s7751_s0 + $0x220] sm:$0x2]   ;;  %v3278_v33 = vsel %vm25_vm5, %v4142_v17, %v3274_v30 }
 0x10f   :  { %v4124_v35 = vld [vmem:[%s7751_s0 + $0x29d] sm:$0x20]   ;;  %v3201_v58 = vsel %vm17_vm3, %v4123_v38, %v3197_v54  ;;  %v4147_v21 = vld [vmem:[%s7751_s0 + $0x23f] sm:$0x4]   ;;  %v3293_v29 = vsel %vm5_vm0, %v4146_v20, %v4145_v40  ;;  %3249 = vrot.lane.b32.xlu0 %v3248_v24, %s4215_s29  ;;  %vm1483_vm0 = vcmask 622144  }
 0x110   :  { %v4125_v45 = vld [vmem:[%s7751_s0 + $0x2bc] sm:$0x40]   ;;  %v3205_v48 = vsel %vm21_vm4, %v4124_v35, %v3201_v58  ;;  %v4143_v27 = vld [vmem:[%s7751_s0 + $0x1da] sm:$0x80]   ;;  %v3297_v2 = vsel %vm9_vm1, %v4147_v21, %v3293_v29  ;;  %vm1587_vm1 = vcmask 589344   ;;  %1484 = vst.msk [vmem:[%s7752_s1] sm:$0xff] %vm1483_vm0, %v7076_v10   ;;  %v1932_v10 = vpop.permute.xlu0 %1931  }
 0x111   :  { %v4126_v34 = vld [vmem:[%s7751_s0 + $0x2db] sm:$0x80]   ;;  %v3209_v5 = vsel %vm25_vm5, %v4125_v45, %v3205_v48  ;;  %v4148_v37 = vld [vmem:[%s7751_s0 + $0x25e] sm:$0x8]   ;;  %3702 = vst.msk [vmem:[%s7752_s1 + $0x8] sm:$0xff] %vm1483_vm0, %v7122_v42   ;;  %3711 = vst.msk [vmem:[%s7752_s1 + $0x10] sm:$0xff] %vm1483_vm0, %v7160_v46   ;;  %v3282_v42 = vsel %vm29_vm6, %v4143_v27, %v3278_v33 }
 0x112   :  { %v3213_v43 = vsel %vm29_vm6, %v4126_v34, %v3209_v5  ;;  %v4149_v19 = vld [vmem:[%s7751_s0 + $0x27d] sm:$0x10]   ;;  %v3301_v3 = vsel %vm13_vm2, %v4148_v37, %v3297_v2  ;;  %vm1691_vm2 = vcmask 556544   ;;  %1588 = vst.msk [vmem:[%s7752_s1] sm:$0xff] %vm1587_vm1, %v7198_v51   ;;  %3728 = vst.msk [vmem:[%s7752_s1 + $0x8] sm:$0xff] %vm1587_vm1, %v7224_v28   ;;  %vm3147_vm0 = vcmask 97344  }
 0x113   :  { %3214 = vrot.lane.b32.xlu1 %v3213_v43, %s4214_s3  ;;  %v4150_v32 = vld [vmem:[%s7751_s0 + $0x29c] sm:$0x20]   ;;  %v3305_v46 = vsel %vm17_vm3, %v4149_v19, %v3301_v3  ;;  %3737 = vst.msk [vmem:[%s7752_s1 + $0x10] sm:$0xff] %vm1587_vm1, %v7270_v25   ;;  %vm1899_vm3 = vcmask 490944   ;;  %v1967_v25 = vpop.permute.xlu1 %1966   ;;  %vm3251_vm1 = vcmask 64544  }
 0x114   :  { %v4151_v38 = vld [vmem:[%s7751_s0 + $0x2bb] sm:$0x40]   ;;  %v3309_v51 = vsel %vm21_vm4, %v4150_v32, %v3305_v46  ;;  %1692 = vst.msk [vmem:[%s7752_s1] sm:$0xff] %vm1691_vm2, %v7323_v41   ;;  %3754 = vst.msk [vmem:[%s7752_s1 + $0x8] sm:$0xff] %vm1691_vm2, %v7361_v16   ;;  %vm2003_vm4 = vcmask 458144   ;;  %v2002_v16 = vpop.permute.xlu0 %2001  }
 0x115   :  { %v4152_v35 = vld [vmem:[%s7751_s0 + $0x2da] sm:$0x80]   ;;  %3763 = vst.msk [vmem:[%s7752_s1 + $0x10] sm:$0xff] %vm1691_vm2, %v7384_v8   ;;  %v3313_v28 = vsel %vm25_vm5, %v4151_v38, %v3309_v51  ;;  %vm2107_vm5 = vcmask 425344  }
 0x116   :  { %1796 = vst.msk [vmem:[%s7752_s1] sm:$0xff] %vm1795_vm12, %v7421_v31   ;;  %3780 = vst.msk [vmem:[%s7752_s1 + $0x8] sm:$0xff] %vm1795_vm12, %v7459_v55   ;;  %v3317_v41 = vsel %vm29_vm6, %v4152_v35, %v3313_v28  ;;  %vm2211_vm6 = vcmask 392544  }
 0x117   :  { %3283 = vrot.lane.b32.xlu1 %v3282_v42, %s4215_s29  ;;  %3789 = vst.msk [vmem:[%s7752_s1 + $0x10] sm:$0xff] %vm1795_vm12, %v1863_v4   ;;  %3318 = vrot.lane.b32.xlu0 %v3317_v41, %s4215_s29  ;;  %v2036_v8 = vpop.permute.xlu1 %2035  }
 0x118   :  { %1900 = vst.msk [vmem:[%s7752_s1] sm:$0xff] %vm1899_vm3, %v1898_v23   ;;  %3806 = vst.msk [vmem:[%s7752_s1 + $0x8] sm:$0xff] %vm1899_vm3, %v1932_v10  }
 0x119   :  { %3815 = vst.msk [vmem:[%s7752_s1 + $0x10] sm:$0xff] %vm1899_vm3, %v1967_v25  }
 0x11a   :  { %2004 = vst.msk [vmem:[%s7752_s1] sm:$0xff] %vm2003_vm4, %v2002_v16   ;;  %3832 = vst.msk [vmem:[%s7752_s1 + $0x8] sm:$0xff] %vm2003_vm4, %v2036_v8  }
 0x11b   :  { %v2106_v45 = vpop.permute.xlu1 %2105  }
 0x11c   :  { %v2071_v31 = vpop.permute.xlu0 %2070   ;;  %2108 = vst.msk [vmem:[%s7752_s1] sm:$0xff] %vm2107_vm5, %v2106_v45  }
 0x11d   :  { %3841 = vst.msk [vmem:[%s7752_s1 + $0x10] sm:$0xff] %vm2003_vm4, %v2071_v31  }
 0x120   :  { %v2140_v39 = vpop.permute.xlu0 %2139  }
 0x121   :  { %3858 = vst.msk [vmem:[%s7752_s1 + $0x8] sm:$0xff] %vm2107_vm5, %v2140_v39  }
 0x128   :  { %v2175_v59 = vpop.permute.xlu1 %2174  }
 0x129   :  { %3867 = vst.msk [vmem:[%s7752_s1 + $0x10] sm:$0xff] %vm2107_vm5, %v2175_v59   ;;  %v2210_v34 = vpop.permute.xlu0 %2209  }
 0x12a   :  { %2212 = vst.msk [vmem:[%s7752_s1] sm:$0xff] %vm2211_vm6, %v2210_v34  }
 0x12e   :  { %v2244_v47 = vpop.permute.xlu1 %2243  }
 0x12f   :  { %3884 = vst.msk [vmem:[%s7752_s1 + $0x8] sm:$0xff] %vm2211_vm6, %v2244_v47  }
 0x132   :  { %v2314_v50 = vpop.permute.xlu1 %2313  }
 0x133   :  { %2316 = vst.msk [vmem:[%s7752_s1] sm:$0xff] %vm2315_vm13, %v2314_v50  }
 0x134   :  { %v2279_v49 = vpop.permute.xlu0 %2278  }
 0x135   :  { %3893 = vst.msk [vmem:[%s7752_s1 + $0x10] sm:$0xff] %vm2211_vm6, %v2279_v49  }
 0x138   :  { %v2348_v54 = vpop.permute.xlu0 %2347  }
 0x139   :  { %3910 = vst.msk [vmem:[%s7752_s1 + $0x8] sm:$0xff] %vm2315_vm13, %v2348_v54  }
 0x13c   :  { %v2418_v56 = vpop.permute.xlu0 %2417  }
 0x13d   :  { %v2383_v36 = vpop.permute.xlu1 %2382   ;;  %2420 = vst.msk [vmem:[%s7752_s1] sm:$0xff] %vm2419_vm14, %v2418_v56  }
 0x13e   :  { %3919 = vst.msk [vmem:[%s7752_s1 + $0x10] sm:$0xff] %vm2315_vm13, %v2383_v36  }
 0x141   :  { %v2452_v9 = vpop.permute.xlu1 %2451  }
 0x142   :  { %3936 = vst.msk [vmem:[%s7752_s1 + $0x8] sm:$0xff] %vm2419_vm14, %v2452_v9  }
 0x144   :  { %v2487_v52 = vpop.permute.xlu0 %2486  }
 0x145   :  { %3945 = vst.msk [vmem:[%s7752_s1 + $0x10] sm:$0xff] %vm2419_vm14, %v2487_v52   ;;  %v2522_v55 = vpop.permute.xlu1 %2521  }
 0x146   :  { %2524 = vst.msk [vmem:[%s7752_s1] sm:$0xff] %vm2523_vm15, %v2522_v55  }
 0x148   :  { %v2556_v57 = vpop.permute.xlu0 %2555  }
 0x149   :  { %3962 = vst.msk [vmem:[%s7752_s1 + $0x8] sm:$0xff] %vm2523_vm15, %v2556_v57  }
 0x14c   :  { %v2626_v1 = vpop.permute.xlu0 %2625  }
 0x14d   :  { %2628 = vst.msk [vmem:[%s7752_s1] sm:$0xff] %vm2627_vm7, %v2626_v1  }
 0x14f   :  { %v2591_v58 = vpop.permute.xlu1 %2590  }
 0x150   :  { %3971 = vst.msk [vmem:[%s7752_s1 + $0x10] sm:$0xff] %vm2523_vm15, %v2591_v58  }
 0x153   :  { %v2660_v18 = vpop.permute.xlu1 %2659  }
 0x154   :  { %3988 = vst.msk [vmem:[%s7752_s1 + $0x8] sm:$0xff] %vm2627_vm7, %v2660_v18  }
 0x155   :  { %v2695_v61 = vpop.permute.xlu0 %2694  }
 0x156   :  { %3997 = vst.msk [vmem:[%s7752_s1 + $0x10] sm:$0xff] %vm2627_vm7, %v2695_v61  }
 0x157   :  { %v2730_v62 = vpop.permute.xlu1 %2729  }
 0x158   :  { %2732 = vst.msk [vmem:[%s7752_s1] sm:$0xff] %vm2731_vm8, %v2730_v62  }
 0x159   :  { %v2764_v48 = vpop.permute.xlu0 %2763  }
 0x15a   :  { %4014 = vst.msk [vmem:[%s7752_s1 + $0x8] sm:$0xff] %vm2731_vm8, %v2764_v48  }
 0x15d   :  { %v2834_v63 = vpop.permute.xlu0 %2833  }
 0x15e   :  { %2836 = vst.msk [vmem:[%s7752_s1] sm:$0xff] %vm2835_vm9, %v2834_v63  }
 0x160   :  { %v2799_v44 = vpop.permute.xlu1 %2798  }
 0x161   :  { %4023 = vst.msk [vmem:[%s7752_s1 + $0x10] sm:$0xff] %vm2731_vm8, %v2799_v44  }
 0x164   :  { %v2868_v0 = vpop.permute.xlu1 %2867  }
 0x165   :  { %4040 = vst.msk [vmem:[%s7752_s1 + $0x8] sm:$0xff] %vm2835_vm9, %v2868_v0  }
 0x168   :  { %v2903_v4 = vpop.permute.xlu0 %2902   ;;  %v2938_v5 = vpop.permute.xlu1 %2937  }
 0x169   :  { %4049 = vst.msk [vmem:[%s7752_s1 + $0x10] sm:$0xff] %vm2835_vm9, %v2903_v4  }
 0x16a   :  { %2940 = vst.msk [vmem:[%s7752_s1] sm:$0xff] %vm2939_vm10, %v2938_v5  }
 0x16c   :  { %v2972_v6 = vpop.permute.xlu0 %2971  }
 0x16d   :  { %4066 = vst.msk [vmem:[%s7752_s1 + $0x8] sm:$0xff] %vm2939_vm10, %v2972_v6  }
 0x170   :  { %v3007_v60 = vpop.permute.xlu1 %3006   ;;  %v3042_v22 = vpop.permute.xlu0 %3041  }
 0x171   :  { %4075 = vst.msk [vmem:[%s7752_s1 + $0x10] sm:$0xff] %vm2939_vm10, %v3007_v60  }
 0x172   :  { %3044 = vst.msk [vmem:[%s7752_s1] sm:$0xff] %vm3043_vm11, %v3042_v22  }
 0x174   :  { %v3076_v7 = vpop.permute.xlu1 %3075  }
 0x175   :  { %4092 = vst.msk [vmem:[%s7752_s1 + $0x8] sm:$0xff] %vm3043_vm11, %v3076_v7  }
 0x178   :  { %v3111_v11 = vpop.permute.xlu0 %3110   ;;  %v3146_v43 = vpop.permute.xlu1 %3145  }
 0x179   :  { %4101 = vst.msk [vmem:[%s7752_s1 + $0x10] sm:$0xff] %vm3043_vm11, %v3111_v11  }
 0x17a   :  { %3148 = vst.msk [vmem:[%s7752_s1] sm:$0xff] %vm3147_vm0, %v3146_v43  }
 0x17d   :  { %v3180_v14 = vpop.permute.xlu0 %3179  }
 0x17e   :  { %4118 = vst.msk [vmem:[%s7752_s1 + $0x8] sm:$0xff] %vm3147_vm0, %v3180_v14  }
 0x181   :  { %v3250_v15 = vpop.permute.xlu0 %3249  }
 0x182   :  { %3252 = vst.msk [vmem:[%s7752_s1] sm:$0xff] %vm3251_vm1, %v3250_v15  }
 0x185   :  { %v3215_v13 = vpop.permute.xlu1 %3214  }
 0x186   :  { %4127 = vst.msk [vmem:[%s7752_s1 + $0x10] sm:$0xff] %vm3147_vm0, %v3215_v13  }
 0x189   :  { %v3284_v17 = vpop.permute.xlu1 %3283   ;;  %v3319_v53 = vpop.permute.xlu0 %3318  }
 0x18a   :  { %4144 = vst.msk [vmem:[%s7752_s1 + $0x8] sm:$0xff] %vm3251_vm1, %v3284_v17   ;;  %4153 = vst.msk [vmem:[%s7752_s1 + $0x10] sm:$0xff] %vm3251_vm1, %v3319_v53  }

// kernel: _forward_tuple.1
= control target key start
LH: loop header
LB: loop body
LE: loop exit
PB: predicated region body
PF: predicated region fallthrough
CT: control target
= control target key end

     0   :  { %s71_s0 = inlined_call_operand.vmem [shape: f32[3,8,128], index: 0, kind: input, shape index: {}]   ;;  %s72_s1 = inlined_call_operand.vmem [shape: f32[3,8,128], index: 1, kind: input, shape index: {}]   ;;  %s73_s2 = inlined_call_operand.vmem [shape: f32[8,128], index: 2, kind: output, shape index: {}]  }
   0x1   :  { %v11_v0 = vld [vmem:[%s71_s0] sm:$0xff]  ;;  %v31_v2 = vld [vmem:[%s71_s0 + $0x8] sm:$0xff]  ;;  %v33_v5 = vld [vmem:[%s71_s0 + $0x10] sm:$0xff] }
   0x2   :  { %v12_v1 = vld [vmem:[%s72_s1] sm:$0xff]  ;;  %v32_v4 = vld [vmem:[%s72_s1 + $0x8] sm:$0xff]  ;;  %v34_v6 = vld [vmem:[%s72_s1 + $0x10] sm:$0xff] }
   0x3   :  { %v13_v3 = vmul.f32 %v12_v1, %v11_v0  ;;  %v18_v7 = vmul.f32 %v32_v4, %v31_v2  ;;  %v24_v8 = vmul.f32 %v34_v6, %v33_v5 }
   0x5   :  { %v19_v9 = vadd.f32 %v18_v7, %v13_v3 }
   0x7   :  { %v25_v10 = vadd.f32 %v24_v8, %v19_v9 }
   0x9   :  { %26 = vst [vmem:[%s73_s2] sm:$0xff] %v25_v10 }

</bundles_post_ra>
